<compile_context>
chip_gen: v7x
topology: tpu7x:2x2x1
jax: 0.10.0
libtpu: 0.0.40
codegen_flags: <defaults>
</compile_context>

<pallas_src>
import functools

import jax
import jax.numpy as jnp
from jax.experimental import pallas as pl
from jax.experimental.pallas import tpu as pltpu


# ---------------------------------------------------------------------------
# Kernel
# ---------------------------------------------------------------------------
def _ensemble_chunk_kernel(x_ref, w1_ref, b1_ref, w2_ref, b2_ref, o_ref, *,
                           members_per_step, hidden, d_out, fused_w2):
    """One grid step == forward pass of `members_per_step` ensemble members."""
    k, H, O = members_per_step, hidden, d_out

    x = x_ref[...]                                                  # (B, D)

    # ---- Layer 1: all k members fused into one lane-dense MXU matmul.
    #      (B, D) @ (D, k*H) -> (B, k*H), f32 accumulation.
    h = jnp.dot(x, w1_ref[...], preferred_element_type=jnp.float32)
    h = jnp.maximum(h + b1_ref[...], 0.0)                           # f32 bias
    h = h.astype(w2_ref.dtype)

    if fused_w2:
        # ---- Layer 2 as ONE matmul against the pre-packed block-diagonal W2:
        #      (B, k*H) @ (k*H, k*O) -> (B, k*O).  No per-member slices/concat.
        y = jnp.dot(h, w2_ref[0], preferred_element_type=jnp.float32)
    else:
        # ---- Layer 2 per member (small static unrolled loop).  The W2 block
        #      is the lane-dense (H, k*O) slab; static column slices select
        #      each member's W2_e^T.  Results are concatenated into a single
        #      lane-dense (B, k*O) slab so bias add + store happen once.
        w2 = w2_ref[...]
        ys = [jnp.dot(h[:, j * H:(j + 1) * H], w2[:, j * O:(j + 1) * O],
                      preferred_element_type=jnp.float32)
              for j in range(k)]
        y = jnp.concatenate(ys, axis=-1)                            # (B, k*O)

    o_ref[...] = (y + b2_ref[...]).astype(o_ref.dtype)


# ---------------------------------------------------------------------------
# One-time parameter re-layout
# ---------------------------------------------------------------------------
def pack_ensemble_params(w1, b1, w2, b2, *, members_per_step, compute_dtype=None,
                         fuse_layer2=False):
    """Re-layout PyTorch stack_module_state params for the kernel (do once).

    In (nn.Linear convention, stacked on a leading ensemble axis):
      w1 (E, H, D), b1 (E, H), w2 (E, O, H), b2 (E, O)
    Out:
      w1_cat (D, E*H)                  columns [e*H:(e+1)*H] = W1_e^T
      b1_cat (1, E*H) float32
      w2_pk  (H, E*O)                  lane-dense, columns [e*O:(e+1)*O] = W2_e^T
             or (E//k, k*H, k*O)       block-diagonal chunks when fuse_layer2
      b2_cat (1, E*O) float32
    `compute_dtype` (e.g. jnp.bfloat16) casts the streamed weights; biases and
    MXU accumulation stay f32.
    """
    E, H, D = w1.shape
    O = w2.shape[1]
    k = members_per_step
    assert E % k == 0, (E, k)
    wdt = w1.dtype if compute_dtype is None else jnp.dtype(compute_dtype)

    w1_cat = jnp.transpose(w1, (2, 0, 1)).reshape(D, E * H).astype(wdt)
    b1_cat = b1.reshape(1, E * H).astype(jnp.float32)
    b2_cat = b2.reshape(1, E * O).astype(jnp.float32)

    w2_t = jnp.transpose(w2, (0, 2, 1))                             # (E, H, O) = W2_e^T
    if fuse_layer2:
        G = E // k
        eye = jnp.eye(k, dtype=w2_t.dtype)
        # bd[g, j*H + h, i*O + o] = W2_{g*k+j}^T[h, o] * delta(j, i)
        w2_pk = jnp.einsum('gjho,ji->gjhio', w2_t.reshape(G, k, H, O), eye)
        w2_pk = w2_pk.reshape(G, k * H, k * O).astype(wdt)
    else:
        w2_pk = jnp.transpose(w2_t, (1, 0, 2)).reshape(H, E * O).astype(wdt)
    return w1_cat, b1_cat, w2_pk, b2_cat


# ---------------------------------------------------------------------------
# Generation-aware schedule selection
# ---------------------------------------------------------------------------
def _pad_tile_bytes(rows, cols, itemsize):
    """VMEM footprint of a (rows, cols) tile: sublane-rounded rows x 128-lane cols."""
    sub = max(8, 32 // itemsize)            # 8 (f32), 16 (bf16), 32 (int8) sublanes
    return (-(-rows // sub) * sub) * (-(-cols // 128) * 128) * itemsize


def choose_schedule(E, B, D, H, O, *, w_itemsize, out_itemsize=4,
                    forced_members_per_step=None):
    """Pick (members_per_step, fuse_layer2, vmem_limit_bytes)."""
    try:
        vmem_cap = int(pltpu.get_tpu_info().vmem_capacity_bytes)
    except Exception:                        # query unavailable -> assume 128 MiB class
        vmem_cap = 128 * 1024 * 1024
    budget = int(vmem_cap * 0.45)            # target for the double-buffered block set
    vmem_limit = int(min(vmem_cap * 0.75, vmem_cap - (8 << 20)))
    # v7x-class chips (64 MiB VMEM) have 2 TensorCores sharing the chip: keep an
    # even >= 2-step grid there so megacore sharding balances the weight DMAs.
    # Single-TC chips (v5e/v6e, 128 MiB) are allowed grid=(1,) with a maximal chunk.
    prefer_multi_step = vmem_cap <= 80 * 1024 * 1024

    def lane_ok(k):
        # (8, 128) BlockSpec rule: lane-dims must be 128-multiples or full-extent.
        return k == E or (k * H % 128 == 0 and k * O % 128 == 0)

    def chunk_bytes(k, fused):
        w = w_itemsize
        b = 2 * _pad_tile_bytes(B, D, w)                      # x (2 bufs, conservative)
        b += 2 * _pad_tile_bytes(D, k * H, w)                 # W1 block
        if fused:
            b += 2 * _pad_tile_bytes(k * H, k * O, w)         # block-diagonal W2
        else:
            b += 2 * _pad_tile_bytes(H, k * O, w)             # lane-dense W2
        b += 2 * _pad_tile_bytes(1, k * H, 4)                 # f32 b1 (8-sublane pad)
        b += 2 * _pad_tile_bytes(1, k * O, 4)                 # f32 b2
        b += 2 * _pad_tile_bytes(B, k * O, out_itemsize)      # output slab
        # in-kernel live values: f32 h, compute-dtype h, y + concat scratch
        b += _pad_tile_bytes(B, k * H, 4) + _pad_tile_bytes(B, k * H, w)
        b += 3 * _pad_tile_bytes(B, k * O, 4)
        return b

    divisors = [d for d in range(1, E + 1) if E % d == 0]
    cands = [d for d in divisors if lane_ok(d)] or [E]

    if forced_members_per_step is not None:
        k = int(forced_members_per_step)
        assert E % k == 0, (E, k)
    else:
        fitting = [d for d in cands if chunk_bytes(d, False) <= budget]
        if fitting:
            k = max(fitting)                                  # biggest DMAs, fewest steps
            if prefer_multi_step:
                balanced = [d for d in fitting if E // d >= 2 and (E // d) % 2 == 0]
                if balanced:
                    k = max(balanced)
        else:
            k = min(cands)                                    # best effort (tiny configs)

    # Fuse layer 2 into one block-diagonal matmul only when the extra streamed
    # W2 bytes are a small fraction of the chunk's weight bytes and it fits VMEM.
    fuse = bool((k - 1) * O <= 0.125 * (D + O) and chunk_bytes(k, True) <= budget)

    # Safety: make sure the compiler limit covers whatever we decided to use.
    vmem_limit = int(max(vmem_limit, min(vmem_cap, chunk_bytes(k, fuse) + (4 << 20))))
    return k, fuse, vmem_limit


# ---------------------------------------------------------------------------
# pallas_call wrapper
# ---------------------------------------------------------------------------
@functools.partial(jax.jit,
                   static_argnames=("members_per_step", "fused_w2", "vmem_limit_bytes"))
def ensemble_forward_packed(x, w1_cat, b1_cat, w2_pk, b2_cat, *,
                            members_per_step, fused_w2, vmem_limit_bytes):
    """Forward pass on packed params.  Returns (E, B, O) in x.dtype."""
    B, D = x.shape
    k = members_per_step
    if fused_w2:
        H = w2_pk.shape[1] // k
        O = w2_pk.shape[2] // k
    else:
        H = w2_pk.shape[0]
        O = (b2_cat.shape[1] * H) // w1_cat.shape[1]
    E = w1_cat.shape[1] // H
    assert E % k == 0, (E, k)
    out_dtype = x.dtype
    grid = (E // k,)

    x_c = x.astype(w1_cat.dtype)      # compute dtype follows the streamed weights

    kernel = functools.partial(_ensemble_chunk_kernel, members_per_step=k,
                               hidden=H, d_out=O, fused_w2=fused_w2)

    if fused_w2:
        w2_spec = pl.BlockSpec((1, k * H, k * O), lambda g: (g, 0, 0))
        l2_flops = 2 * B * E * H * k * O
    else:
        w2_spec = pl.BlockSpec((H, k * O), lambda g: (0, g))
        l2_flops = 2 * B * E * H * O

    bytes_accessed = (x_c.size * x_c.dtype.itemsize
                      + w1_cat.size * w1_cat.dtype.itemsize
                      + w2_pk.size * w2_pk.dtype.itemsize
                      + b1_cat.size * b1_cat.dtype.itemsize
                      + b2_cat.size * b2_cat.dtype.itemsize
                      + B * E * O * jnp.dtype(out_dtype).itemsize)
    cost = pl.CostEstimate(flops=int(2 * B * E * H * D + l2_flops),
                           transcendentals=0,
                           bytes_accessed=int(bytes_accessed))

    out_flat = pl.pallas_call(
        kernel,
        out_shape=jax.ShapeDtypeStruct((B, E * O), out_dtype),
        grid=grid,
        in_specs=[
            pl.BlockSpec((B, D), lambda g: (0, 0)),          # x: shared by all members
            pl.BlockSpec((D, k * H), lambda g: (0, g)),      # W1^T columns for chunk g
            pl.BlockSpec((1, k * H), lambda g: (0, g)),      # b1 for chunk g
            w2_spec,                                         # W2 for chunk g
            pl.BlockSpec((1, k * O), lambda g: (0, g)),      # b2 for chunk g
        ],
        out_specs=pl.BlockSpec((B, k * O), lambda g: (0, g)),
        compiler_params=pltpu.CompilerParams(
            dimension_semantics=("parallel",),
            vmem_limit_bytes=int(vmem_limit_bytes),
        ),
        cost_estimate=cost,
    )(x_c, w1_cat, b1_cat, w2_pk, b2_cat)

    # Lane-dense (B, E*O) slab -> (E, B, O)  (out_dims=0 semantics of torch.vmap)
    return out_flat.reshape(B, E, O).transpose(1, 0, 2)


def vectorized_ensemble_forward(x, w1, b1, w2, b2, *, members_per_step=None,
                                compute_dtype=None, fuse_layer2=None):
    """VectorizedEnsemble.forward for an MLP base model.

    Args (PyTorch stack_module_state layout):
      x  (B, D)     shared input (vmap in_dims=None)
      w1 (E, H, D), b1 (E, H), w2 (E, O, H), b2 (E, O)
    Returns (E, B, O).

    Perf note: the kernel is weight-HBM-bound at small B (arithmetic intensity
    ~ 2*B / itemsize flops/byte); batch multiple inputs / timesteps into B
    before calling when possible.  For repeated calls with fixed params, call
    `pack_ensemble_params` once and reuse `ensemble_forward_packed`.
    """
    E, H, D = w1.shape
    O = w2.shape[1]
    B = x.shape[0]
    wdt = w1.dtype if compute_dtype is None else jnp.dtype(compute_dtype)
    k, fuse_auto, vmem_limit = choose_schedule(
        E, B, D, H, O, w_itemsize=jnp.dtype(wdt).itemsize,
        out_itemsize=jnp.dtype(x.dtype).itemsize,
        forced_members_per_step=members_per_step)
    fuse = fuse_auto if fuse_layer2 is None else bool(fuse_layer2)

    packed = pack_ensemble_params(w1, b1, w2, b2, members_per_step=k,
                                  compute_dtype=compute_dtype, fuse_layer2=fuse)
    return ensemble_forward_packed(x, *packed, members_per_step=k,
                                   fused_w2=fuse, vmem_limit_bytes=vmem_limit)


# ---------------------------------------------------------------------------
# Init + reference (mirrors the PyTorch module)
# ---------------------------------------------------------------------------
def init_ensemble_params(key, ensemble_size, d_in, hidden, d_out, dtype=jnp.float32):
    """He (kaiming) uniform init per member, as in init_kaiming_uniform_."""
    k1, k2, k3, k4 = jax.random.split(key, 4)
    bw1, bw2 = (6.0 / d_in) ** 0.5, (6.0 / hidden) ** 0.5
    bb1, bb2 = 1.0 / (d_in ** 0.5), 1.0 / (hidden ** 0.5)
    w1 = jax.random.uniform(k1, (ensemble_size, hidden, d_in), dtype, -bw1, bw1)
    b1 = jax.random.uniform(k2, (ensemble_size, hidden), dtype, -bb1, bb1)
    w2 = jax.random.uniform(k3, (ensemble_size, d_out, hidden), dtype, -bw2, bw2)
    b2 = jax.random.uniform(k4, (ensemble_size, d_out), dtype, -bb2, bb2)
    return w1, b1, w2, b2


def _reference_forward(x, w1, b1, w2, b2):
    """Pure-JAX reference mirroring torch.vmap(functional_call, in_dims=(0,0,None))."""
    def one_member(w1e, b1e, w2e, b2e):
        h = jnp.maximum(x @ w1e.T + b1e, 0.0)
        return h @ w2e.T + b2e
    return jax.vmap(one_member)(w1, b1, w2, b2)


if __name__ == "__main__":
    key = jax.random.PRNGKey(0)
    kx, kp, kq = jax.random.split(key, 3)

    # --- Config A: ensemble of 16 MLPs (32 -> 64 -> 16), batch 8.
    #     Auto schedule: single maximal chunk on 1-TC chips (grid=(1,)),
    #     two balanced chunks on v7x-class chips.  Lane-dense per-member layer 2.
    E, B, D_IN, HIDDEN, D_OUT = 16, 8, 32, 64, 16
    x = jax.random.normal(kx, (B, D_IN), dtype=jnp.float32)
    w1, b1, w2, b2 = init_ensemble_params(kp, E, D_IN, HIDDEN, D_OUT)
    ref = _reference_forward(x, w1, b1, w2, b2)

    out = jax.block_until_ready(vectorized_ensemble_forward(x, w1, b1, w2, b2))
    assert out.shape == (E, B, D_OUT), out.shape
    assert jnp.allclose(out, ref, atol=1e-3, rtol=1e-3), "f32 mismatch vs reference"

    # Forced 8-members-per-step -> grid=(2,): exercises the chunk-indexed BlockSpecs.
    out8 = jax.block_until_ready(
        vectorized_ensemble_forward(x, w1, b1, w2, b2, members_per_step=8))
    assert jnp.allclose(out8, ref, atol=1e-3, rtol=1e-3), "chunked mismatch vs reference"

    # bf16 weight streaming (x cast to bf16 too; f32 biases + MXU accumulation).
    out_bf16 = jax.block_until_ready(
        vectorized_ensemble_forward(x, w1, b1, w2, b2, compute_dtype=jnp.bfloat16))
    assert out_bf16.shape == (E, B, D_OUT), out_bf16.shape
    assert jnp.allclose(out_bf16.astype(jnp.float32), ref, atol=1e-1, rtol=1e-1), \
        "bf16 mismatch vs reference"

    # --- Config B: wide input (512 -> 128 -> 8), ensemble of 4.  Here the extra
    #     block-diagonal W2 bytes are negligible vs W1, so the auto schedule
    #     fuses layer 2 into one MXU matmul.  (Looser tolerance: larger-D
    #     accumulation order / MXU pass differences vs the XLA reference.)
    E2, B2, D2, H2, O2 = 4, 8, 512, 128, 8
    x2 = jax.random.normal(kq, (B2, D2), dtype=jnp.float32)
    p2 = init_ensemble_params(jax.random.PRNGKey(1), E2, D2, H2, O2)
    ref2 = _reference_forward(x2, *p2)
    out2 = jax.block_until_ready(vectorized_ensemble_forward(x2, *p2))
    assert out2.shape == (E2, B2, O2), out2.shape
    assert jnp.allclose(out2, ref2, atol=2e-2, rtol=2e-2), "fused-W2 mismatch vs reference"

    print("KERNEL_OK")
</pallas_src>

<mosaic_0001>
module attributes {stable_mosaic.version = 11 : i64} {
  func.func @_ensemble_chunk_kernel(%arg0: i32, %arg1: memref<8x32xf32, #tpu.memory_space<vmem>>, %arg2: memref<32x1024xf32, #tpu.memory_space<vmem>>, %arg3: memref<1x1024xf32, #tpu.memory_space<vmem>>, %arg4: memref<64x256xf32, #tpu.memory_space<vmem>>, %arg5: memref<1x256xf32, #tpu.memory_space<vmem>>, %arg6: memref<8x256xf32, #tpu.memory_space<vmem>>) attributes {dimension_semantics = [#tpu.dimension_semantics<parallel>], iteration_bounds = array<i64: 1>, scalar_prefetch = 0 : i64, scratch_operands = 0 : i64, tpu.core_type = #tpu.core_type<tc>, window_params = [{pipeline_mode = #tpu.pipeline_mode<synchronous>, transform_indices = @transform_0, window_bounds = array<i64: 8, 32>}, {transform_indices = @transform_1, window_bounds = array<i64: 32, 1024>}, {transform_indices = @transform_2, window_bounds = array<i64: 1, 1024>}, {transform_indices = @transform_3, window_bounds = array<i64: 64, 256>}, {transform_indices = @transform_4, window_bounds = array<i64: 1, 256>}, {transform_indices = @transform_5, window_bounds = array<i64: 8, 256>}]} {
    %c0 = arith.constant 0 : index
    %c0_0 = arith.constant 0 : index
    %0 = vector.load %arg1[%c0, %c0_0] : memref<8x32xf32, #tpu.memory_space<vmem>>, vector<8x32xf32>
    %c0_1 = arith.constant 0 : index
    %c0_2 = arith.constant 0 : index
    %1 = vector.load %arg2[%c0_1, %c0_2] : memref<32x1024xf32, #tpu.memory_space<vmem>>, vector<32x1024xf32>
    %cst = arith.constant dense<0.000000e+00> : vector<8x1024xf32>
    %2 = tpu.matmul %0, %1, %cst {dimension_numbers = #tpu.dot_dimension_numbers<[1], [0], [0], [1], [0, 0, 1, 1], [], []>} : vector<8x32xf32>, vector<32x1024xf32>, vector<8x1024xf32> -> vector<8x1024xf32>
    %c0_3 = arith.constant 0 : index
    %c0_4 = arith.constant 0 : index
    %3 = vector.load %arg3[%c0_3, %c0_4] : memref<1x1024xf32, #tpu.memory_space<vmem>>, vector<1x1024xf32>
    %4 = vector.broadcast %3 : vector<1x1024xf32> to vector<8x1024xf32>
    %5 = arith.addf %2, %4 : vector<8x1024xf32>
    %cst_5 = arith.constant 0.000000e+00 : f32
    %6 = vector.broadcast %cst_5 : f32 to vector<8x1024xf32>
    %7 = arith.maximumf %5, %6 : vector<8x1024xf32>
    %c0_6 = arith.constant 0 : index
    %c0_7 = arith.constant 0 : index
    %8 = vector.load %arg4[%c0_6, %c0_7] : memref<64x256xf32, #tpu.memory_space<vmem>>, vector<64x256xf32>
    %9 = vector.extract_strided_slice %7 {offsets = [0, 0], sizes = [8, 64], strides = [1, 1]} : vector<8x1024xf32> to vector<8x64xf32>
    %10 = vector.extract_strided_slice %8 {offsets = [0, 0], sizes = [64, 16], strides = [1, 1]} : vector<64x256xf32> to vector<64x16xf32>
    %cst_8 = arith.constant dense<0.000000e+00> : vector<8x16xf32>
    %11 = tpu.matmul %9, %10, %cst_8 {dimension_numbers = #tpu.dot_dimension_numbers<[1], [0], [0], [1], [0, 0, 1, 1], [], []>} : vector<8x64xf32>, vector<64x16xf32>, vector<8x16xf32> -> vector<8x16xf32>
    %12 = vector.extract_strided_slice %7 {offsets = [0, 64], sizes = [8, 64], strides = [1, 1]} : vector<8x1024xf32> to vector<8x64xf32>
    %13 = vector.extract_strided_slice %8 {offsets = [0, 16], sizes = [64, 16], strides = [1, 1]} : vector<64x256xf32> to vector<64x16xf32>
    %cst_9 = arith.constant dense<0.000000e+00> : vector<8x16xf32>
    %14 = tpu.matmul %12, %13, %cst_9 {dimension_numbers = #tpu.dot_dimension_numbers<[1], [0], [0], [1], [0, 0, 1, 1], [], []>} : vector<8x64xf32>, vector<64x16xf32>, vector<8x16xf32> -> vector<8x16xf32>
    %15 = vector.extract_strided_slice %7 {offsets = [0, 128], sizes = [8, 64], strides = [1, 1]} : vector<8x1024xf32> to vector<8x64xf32>
    %16 = vector.extract_strided_slice %8 {offsets = [0, 32], sizes = [64, 16], strides = [1, 1]} : vector<64x256xf32> to vector<64x16xf32>
    %cst_10 = arith.constant dense<0.000000e+00> : vector<8x16xf32>
    %17 = tpu.matmul %15, %16, %cst_10 {dimension_numbers = #tpu.dot_dimension_numbers<[1], [0], [0], [1], [0, 0, 1, 1], [], []>} : vector<8x64xf32>, vector<64x16xf32>, vector<8x16xf32> -> vector<8x16xf32>
    %18 = vector.extract_strided_slice %7 {offsets = [0, 192], sizes = [8, 64], strides = [1, 1]} : vector<8x1024xf32> to vector<8x64xf32>
    %19 = vector.extract_strided_slice %8 {offsets = [0, 48], sizes = [64, 16], strides = [1, 1]} : vector<64x256xf32> to vector<64x16xf32>
    %cst_11 = arith.constant dense<0.000000e+00> : vector<8x16xf32>
    %20 = tpu.matmul %18, %19, %cst_11 {dimension_numbers = #tpu.dot_dimension_numbers<[1], [0], [0], [1], [0, 0, 1, 1], [], []>} : vector<8x64xf32>, vector<64x16xf32>, vector<8x16xf32> -> vector<8x16xf32>
    %21 = vector.extract_strided_slice %7 {offsets = [0, 256], sizes = [8, 64], strides = [1, 1]} : vector<8x1024xf32> to vector<8x64xf32>
    %22 = vector.extract_strided_slice %8 {offsets = [0, 64], sizes = [64, 16], strides = [1, 1]} : vector<64x256xf32> to vector<64x16xf32>
    %cst_12 = arith.constant dense<0.000000e+00> : vector<8x16xf32>
    %23 = tpu.matmul %21, %22, %cst_12 {dimension_numbers = #tpu.dot_dimension_numbers<[1], [0], [0], [1], [0, 0, 1, 1], [], []>} : vector<8x64xf32>, vector<64x16xf32>, vector<8x16xf32> -> vector<8x16xf32>
    %24 = vector.extract_strided_slice %7 {offsets = [0, 320], sizes = [8, 64], strides = [1, 1]} : vector<8x1024xf32> to vector<8x64xf32>
    %25 = vector.extract_strided_slice %8 {offsets = [0, 80], sizes = [64, 16], strides = [1, 1]} : vector<64x256xf32> to vector<64x16xf32>
    %cst_13 = arith.constant dense<0.000000e+00> : vector<8x16xf32>
    %26 = tpu.matmul %24, %25, %cst_13 {dimension_numbers = #tpu.dot_dimension_numbers<[1], [0], [0], [1], [0, 0, 1, 1], [], []>} : vector<8x64xf32>, vector<64x16xf32>, vector<8x16xf32> -> vector<8x16xf32>
    %27 = vector.extract_strided_slice %7 {offsets = [0, 384], sizes = [8, 64], strides = [1, 1]} : vector<8x1024xf32> to vector<8x64xf32>
    %28 = vector.extract_strided_slice %8 {offsets = [0, 96], sizes = [64, 16], strides = [1, 1]} : vector<64x256xf32> to vector<64x16xf32>
    %cst_14 = arith.constant dense<0.000000e+00> : vector<8x16xf32>
    %29 = tpu.matmul %27, %28, %cst_14 {dimension_numbers = #tpu.dot_dimension_numbers<[1], [0], [0], [1], [0, 0, 1, 1], [], []>} : vector<8x64xf32>, vector<64x16xf32>, vector<8x16xf32> -> vector<8x16xf32>
    %30 = vector.extract_strided_slice %7 {offsets = [0, 448], sizes = [8, 64], strides = [1, 1]} : vector<8x1024xf32> to vector<8x64xf32>
    %31 = vector.extract_strided_slice %8 {offsets = [0, 112], sizes = [64, 16], strides = [1, 1]} : vector<64x256xf32> to vector<64x16xf32>
    %cst_15 = arith.constant dense<0.000000e+00> : vector<8x16xf32>
    %32 = tpu.matmul %30, %31, %cst_15 {dimension_numbers = #tpu.dot_dimension_numbers<[1], [0], [0], [1], [0, 0, 1, 1], [], []>} : vector<8x64xf32>, vector<64x16xf32>, vector<8x16xf32> -> vector<8x16xf32>
    %33 = vector.extract_strided_slice %7 {offsets = [0, 512], sizes = [8, 64], strides = [1, 1]} : vector<8x1024xf32> to vector<8x64xf32>
    %34 = vector.extract_strided_slice %8 {offsets = [0, 128], sizes = [64, 16], strides = [1, 1]} : vector<64x256xf32> to vector<64x16xf32>
    %cst_16 = arith.constant dense<0.000000e+00> : vector<8x16xf32>
    %35 = tpu.matmul %33, %34, %cst_16 {dimension_numbers = #tpu.dot_dimension_numbers<[1], [0], [0], [1], [0, 0, 1, 1], [], []>} : vector<8x64xf32>, vector<64x16xf32>, vector<8x16xf32> -> vector<8x16xf32>
    %36 = vector.extract_strided_slice %7 {offsets = [0, 576], sizes = [8, 64], strides = [1, 1]} : vector<8x1024xf32> to vector<8x64xf32>
    %37 = vector.extract_strided_slice %8 {offsets = [0, 144], sizes = [64, 16], strides = [1, 1]} : vector<64x256xf32> to vector<64x16xf32>
    %cst_17 = arith.constant dense<0.000000e+00> : vector<8x16xf32>
    %38 = tpu.matmul %36, %37, %cst_17 {dimension_numbers = #tpu.dot_dimension_numbers<[1], [0], [0], [1], [0, 0, 1, 1], [], []>} : vector<8x64xf32>, vector<64x16xf32>, vector<8x16xf32> -> vector<8x16xf32>
    %39 = vector.extract_strided_slice %7 {offsets = [0, 640], sizes = [8, 64], strides = [1, 1]} : vector<8x1024xf32> to vector<8x64xf32>
    %40 = vector.extract_strided_slice %8 {offsets = [0, 160], sizes = [64, 16], strides = [1, 1]} : vector<64x256xf32> to vector<64x16xf32>
    %cst_18 = arith.constant dense<0.000000e+00> : vector<8x16xf32>
    %41 = tpu.matmul %39, %40, %cst_18 {dimension_numbers = #tpu.dot_dimension_numbers<[1], [0], [0], [1], [0, 0, 1, 1], [], []>} : vector<8x64xf32>, vector<64x16xf32>, vector<8x16xf32> -> vector<8x16xf32>
    %42 = vector.extract_strided_slice %7 {offsets = [0, 704], sizes = [8, 64], strides = [1, 1]} : vector<8x1024xf32> to vector<8x64xf32>
    %43 = vector.extract_strided_slice %8 {offsets = [0, 176], sizes = [64, 16], strides = [1, 1]} : vector<64x256xf32> to vector<64x16xf32>
    %cst_19 = arith.constant dense<0.000000e+00> : vector<8x16xf32>
    %44 = tpu.matmul %42, %43, %cst_19 {dimension_numbers = #tpu.dot_dimension_numbers<[1], [0], [0], [1], [0, 0, 1, 1], [], []>} : vector<8x64xf32>, vector<64x16xf32>, vector<8x16xf32> -> vector<8x16xf32>
    %45 = vector.extract_strided_slice %7 {offsets = [0, 768], sizes = [8, 64], strides = [1, 1]} : vector<8x1024xf32> to vector<8x64xf32>
    %46 = vector.extract_strided_slice %8 {offsets = [0, 192], sizes = [64, 16], strides = [1, 1]} : vector<64x256xf32> to vector<64x16xf32>
    %cst_20 = arith.constant dense<0.000000e+00> : vector<8x16xf32>
    %47 = tpu.matmul %45, %46, %cst_20 {dimension_numbers = #tpu.dot_dimension_numbers<[1], [0], [0], [1], [0, 0, 1, 1], [], []>} : vector<8x64xf32>, vector<64x16xf32>, vector<8x16xf32> -> vector<8x16xf32>
    %48 = vector.extract_strided_slice %7 {offsets = [0, 832], sizes = [8, 64], strides = [1, 1]} : vector<8x1024xf32> to vector<8x64xf32>
    %49 = vector.extract_strided_slice %8 {offsets = [0, 208], sizes = [64, 16], strides = [1, 1]} : vector<64x256xf32> to vector<64x16xf32>
    %cst_21 = arith.constant dense<0.000000e+00> : vector<8x16xf32>
    %50 = tpu.matmul %48, %49, %cst_21 {dimension_numbers = #tpu.dot_dimension_numbers<[1], [0], [0], [1], [0, 0, 1, 1], [], []>} : vector<8x64xf32>, vector<64x16xf32>, vector<8x16xf32> -> vector<8x16xf32>
    %51 = vector.extract_strided_slice %7 {offsets = [0, 896], sizes = [8, 64], strides = [1, 1]} : vector<8x1024xf32> to vector<8x64xf32>
    %52 = vector.extract_strided_slice %8 {offsets = [0, 224], sizes = [64, 16], strides = [1, 1]} : vector<64x256xf32> to vector<64x16xf32>
    %cst_22 = arith.constant dense<0.000000e+00> : vector<8x16xf32>
    %53 = tpu.matmul %51, %52, %cst_22 {dimension_numbers = #tpu.dot_dimension_numbers<[1], [0], [0], [1], [0, 0, 1, 1], [], []>} : vector<8x64xf32>, vector<64x16xf32>, vector<8x16xf32> -> vector<8x16xf32>
    %54 = vector.extract_strided_slice %7 {offsets = [0, 960], sizes = [8, 64], strides = [1, 1]} : vector<8x1024xf32> to vector<8x64xf32>
    %55 = vector.extract_strided_slice %8 {offsets = [0, 240], sizes = [64, 16], strides = [1, 1]} : vector<64x256xf32> to vector<64x16xf32>
    %cst_23 = arith.constant dense<0.000000e+00> : vector<8x16xf32>
    %56 = tpu.matmul %54, %55, %cst_23 {dimension_numbers = #tpu.dot_dimension_numbers<[1], [0], [0], [1], [0, 0, 1, 1], [], []>} : vector<8x64xf32>, vector<64x16xf32>, vector<8x16xf32> -> vector<8x16xf32>
    %57 = tpu.concatenate %11, %14, %17, %20, %23, %26, %29, %32, %35, %38, %41, %44, %47, %50, %53, %56 in 1 : vector<8x16xf32>, vector<8x16xf32>, vector<8x16xf32>, vector<8x16xf32>, vector<8x16xf32>, vector<8x16xf32>, vector<8x16xf32>, vector<8x16xf32>, vector<8x16xf32>, vector<8x16xf32>, vector<8x16xf32>, vector<8x16xf32>, vector<8x16xf32>, vector<8x16xf32>, vector<8x16xf32>, vector<8x16xf32> -> vector<8x256xf32>
    %c0_24 = arith.constant 0 : index
    %c0_25 = arith.constant 0 : index
    %58 = vector.load %arg5[%c0_24, %c0_25] : memref<1x256xf32, #tpu.memory_space<vmem>>, vector<1x256xf32>
    %59 = vector.broadcast %58 : vector<1x256xf32> to vector<8x256xf32>
    %60 = arith.addf %57, %59 : vector<8x256xf32>
    %c0_26 = arith.constant 0 : index
    %c0_27 = arith.constant 0 : index
    %61 = vector.load %arg6[%c0_26, %c0_27] : memref<8x256xf32, #tpu.memory_space<vmem>>, vector<8x256xf32>
    tpu.vector_store %arg6[%c0_26, %c0_27], %60 {strides = array<i32>} : memref<8x256xf32, #tpu.memory_space<vmem>>, vector<8x256xf32>,
    return
  }
  func.func @transform_0(%arg0: i32) -> (i32, i32) {
    %c0_i32 = arith.constant 0 : i32
    %c0_i32_0 = arith.constant 0 : i32
    %c0_i32_1 = arith.constant 0 : i32
    return %c0_i32, %c0_i32_0 : i32, i32
  }
  func.func @transform_1(%arg0: i32) -> (i32, i32) {
    %c0_i32 = arith.constant 0 : i32
    %c0_i32_0 = arith.constant 0 : i32
    return %c0_i32, %arg0 : i32, i32
  }
  func.func @transform_2(%arg0: i32) -> (i32, i32) {
    %c0_i32 = arith.constant 0 : i32
    %c0_i32_0 = arith.constant 0 : i32
    return %c0_i32, %arg0 : i32, i32
  }
  func.func @transform_3(%arg0: i32) -> (i32, i32) {
    %c0_i32 = arith.constant 0 : i32
    %c0_i32_0 = arith.constant 0 : i32
    return %c0_i32, %arg0 : i32, i32
  }
  func.func @transform_4(%arg0: i32) -> (i32, i32) {
    %c0_i32 = arith.constant 0 : i32
    %c0_i32_0 = arith.constant 0 : i32
    return %c0_i32, %arg0 : i32, i32
  }
  func.func @transform_5(%arg0: i32) -> (i32, i32) {
    %c0_i32 = arith.constant 0 : i32
    %c0_i32_0 = arith.constant 0 : i32
    return %c0_i32, %arg0 : i32, i32
  }
}

</mosaic_0001>

<bundles_post_ra>
// kernel: ensemble_forward_packed.1
= control target key start
LH: loop header
LB: loop body
LE: loop exit
PB: predicated region body
PF: predicated region fallthrough
CT: control target
= control target key end

     0   :  { %10 = vsyncpa [#allocation3], 0  ;;  %s3748_s0 = inlined_call_operand.hbm [shape: f32[8,32], index: 0, kind: input, shape index: {}]   ;;  %s3749_s1 = inlined_call_operand.hbm [shape: f32[32,1024], index: 1, kind: input, shape index: {}]   ;;  %s3750_s2 = inlined_call_operand.hbm [shape: f32[1,1024], index: 2, kind: input, shape index: {}]   ;;  %s3751_s3 = inlined_call_operand.hbm [shape: f32[64,256], index: 3, kind: input, shape index: {}]   ;;  %s3752_s4 = inlined_call_operand.hbm [shape: f32[1,256], index: 4, kind: input, shape index: {}]   ;;  %s3753_s5 = inlined_call_operand.hbm [shape: f32[8,256], index: 5, kind: output, shape index: {}]  }
   0x1   :  { %11 = vsyncpa [#allocation6], 0 }
   0x2   :  { %12 = vsyncpa [#allocation9], 0 }
   0x3   :  { %13 = vsyncpa [#allocation4], 0  ;;  %s3237_s18 = smov [#allocation5]   ;;  %s3097_s22 = scalar_lea.hbm %s3749_s1, 4096 }
   0x4   :  { %s29_s19 = sshll.u32 %s3237_s18, 4  ;;  %p3098_p0 = scmp.ne.s32.totalorder %s3749_s1, %s3097_s22  ;;  %s30_s19 = int_to_ptr.vmem [resolvable:$true] %s29_s19 }
   0x5   :  { %p3101_p1 = scmp.lt.u32.totalorder %s3097_s22, %s3749_s1 }
   0x7   :  { %p3103_p2 = pnand %p3101_p1, %p3098_p0 }
   0x9   :  { %3106 = shalt.err (!%p3103_p2)
}
   0xa   :  { %s3107_s27 = scalar_lea.vmem %s30_s19, 4096  ;;  %p3112_p4 = scmp.lt.s32.totalorder %s30_s19, %s30_s19 }
   0xb   :  { %p3108_p3 = scmp.ne.s32.totalorder %s30_s19, %s3107_s27  ;;  %p3113_p5 = scmp.lt.s32.totalorder %s3107_s27, %s3107_s27 }
   0xd   :  { %p3114_p6 = por %p3113_p5, %p3112_p4 }
   0xf   :  { %p3115_p7 = pnand %p3114_p6, %p3108_p3 }
  0x11   :  { %3118 = shalt.err (!%p3115_p7)
}
  0x12   :  { %s3238_s28 = smov 1024   ;;  %s3239_s29 = smov 64  }
  0x13   :  { %35 = dma.hbm_to_vmem [thread:$0]  %s3749_s1, 4096, %s30_s19, [#allocation6], %s3238_s28, %s3238_s28, %s3239_s29  }
  0x14   :  { %s3240_s7 = smov [#allocation8]   ;;  %s3119_s11 = scalar_lea.hbm %s3751_s3, 2048 }
  0x15   :  { %s51_s8 = sshll.u32 %s3240_s7, 4  ;;  %p3120_p8 = scmp.ne.s32.totalorder %s3751_s3, %s3119_s11  ;;  %s52_s8 = int_to_ptr.vmem [resolvable:$true] %s51_s8 }
  0x16   :  { %p3123_p9 = scmp.lt.u32.totalorder %s3119_s11, %s3751_s3 }
  0x18   :  { %p3125_p10 = pnand %p3123_p9, %p3120_p8 }
  0x1a   :  { %3128 = shalt.err (!%p3125_p10)
}
  0x1b   :  { %s3129_s16 = scalar_lea.vmem %s52_s8, 2048  ;;  %p3134_p12 = scmp.lt.s32.totalorder %s52_s8, %s52_s8 }
  0x1c   :  { %p3130_p11 = scmp.ne.s32.totalorder %s52_s8, %s3129_s16  ;;  %p3135_p13 = scmp.lt.s32.totalorder %s3129_s16, %s3129_s16 }
  0x1e   :  { %p3136_p0 = por %p3135_p13, %p3134_p12 }
  0x20   :  { %p3137_p1 = pnand %p3136_p0, %p3130_p11 }
  0x22   :  { %3140 = shalt.err (!%p3137_p1)
}
  0x23   :  { %s3241_s1 = smov 256   ;;  %s3242_s17 = smov 16  }
  0x24   :  { %57 = dma.hbm_to_vmem [thread:$0]  %s3751_s3, 2048, %s52_s8, [#allocation9], %s3241_s1, %s3241_s1, %s3242_s17  }
  0x25   :  { %s3243_s20 = smov [#allocation2]   ;;  %s3244_s22 = smov [#allocation7]  }
  0x26   :  { %s20_s21 = sshll.u32 %s3243_s20, 4  ;;  %s42_s23 = sshll.u32 %s3244_s22, 4  ;;  %s21_s21 = int_to_ptr.vmem [resolvable:$true] %s20_s21  ;;  %s43_s23 = int_to_ptr.vmem [resolvable:$true] %s42_s23 }
  0x27   :  { %s3141_s26 = scalar_lea.hbm %s3748_s0, 128 }
  0x28   :  { %p3142_p2 = scmp.ne.s32.totalorder %s3748_s0, %s3141_s26  ;;  %p3145_p3 = scmp.lt.u32.totalorder %s3141_s26, %s3748_s0 }
  0x2a   :  { %p3147_p4 = pnand %p3145_p3, %p3142_p2 }
  0x2c   :  { %3150 = shalt.err (!%p3147_p4)
}
  0x2d   :  { %s3151_s3 = scalar_lea.vmem %s21_s21, 128  ;;  %p3156_p6 = scmp.lt.s32.totalorder %s21_s21, %s21_s21 }
  0x2e   :  { %p3152_p5 = scmp.ne.s32.totalorder %s21_s21, %s3151_s3  ;;  %p3157_p7 = scmp.lt.s32.totalorder %s3151_s3, %s3151_s3 }
  0x30   :  { %p3158_p8 = por %p3157_p7, %p3156_p6 }
  0x32   :  { %p3159_p9 = pnand %p3158_p8, %p3152_p5 }
  0x34   :  { %3162 = shalt.err (!%p3159_p9)
}
  0x35   :  { %23 = dma.hbm_to_vmem [thread:$0]  %s3748_s0, 128, %s21_s21, [#allocation3]  }
  0x36   :  { %s3163_s11 = scalar_lea.hbm %s3750_s2, 128 }
  0x37   :  { %p3164_p10 = scmp.ne.s32.totalorder %s3750_s2, %s3163_s11  ;;  %p3167_p11 = scmp.lt.u32.totalorder %s3163_s11, %s3750_s2 }
  0x39   :  { %p3169_p12 = pnand %p3167_p11, %p3164_p10 }
  0x3b   :  { %3172 = shalt.err (!%p3169_p12)
}
  0x3c   :  { %s3173_s16 = scalar_lea.vmem %s43_s23, 128  ;;  %p3178_p0 = scmp.lt.s32.totalorder %s43_s23, %s43_s23 }
  0x3d   :  { %p3174_p13 = scmp.ne.s32.totalorder %s43_s23, %s3173_s16  ;;  %p3179_p1 = scmp.lt.s32.totalorder %s3173_s16, %s3173_s16 }
  0x3f   :  { %p3180_p2 = por %p3179_p1, %p3178_p0 }
  0x41   :  { %p3181_p3 = pnand %p3180_p2, %p3174_p13 }
  0x43   :  { %3184 = shalt.err (!%p3181_p3)
}
  0x44   :  { %45 = dma.hbm_to_vmem [thread:$0]  %s3750_s2, 128, %s43_s23, [#allocation6]  }
  0x45   :  { %s3245_s18 = smov [#allocation10]   ;;  %s3185_s22 = scalar_lea.hbm %s3752_s4, 32 }
  0x46   :  { %s64_s19 = sshll.u32 %s3245_s18, 4  ;;  %p3186_p4 = scmp.ne.s32.totalorder %s3752_s4, %s3185_s22  ;;  %s65_s19 = int_to_ptr.vmem [resolvable:$true] %s64_s19 }
  0x47   :  { %p3189_p5 = scmp.lt.u32.totalorder %s3185_s22, %s3752_s4 }
  0x49   :  { %p3191_p6 = pnand %p3189_p5, %p3186_p4 }
  0x4b   :  { %3194 = shalt.err (!%p3191_p6)
}
  0x4c   :  { %s3195_s28 = scalar_lea.vmem %s65_s19, 32  ;;  %p3200_p8 = scmp.lt.s32.totalorder %s65_s19, %s65_s19 }
  0x4d   :  { %p3196_p7 = scmp.ne.s32.totalorder %s65_s19, %s3195_s28  ;;  %p3201_p9 = scmp.lt.s32.totalorder %s3195_s28, %s3195_s28 }
  0x4f   :  { %p3202_p10 = por %p3201_p9, %p3200_p8 }
  0x51   :  { %p3203_p11 = pnand %p3202_p10, %p3196_p7 }
  0x53   :  { %3206 = shalt.err (!%p3203_p11)
}
  0x54   :  { %67 = dma.hbm_to_vmem [thread:$0]  %s3752_s4, 32, %s65_s19, [#allocation9]  }
  0x55   :  { %3229 = dma.done.wait [#allocation3], 128  }
  0x56   :  { %3230 = vsyncadd [#allocation3], 4294967168 }
  0x57   :  { %3231 = dma.done.wait [#allocation6], 4224  }
  0x58   :  { %3232 = vsyncadd [#allocation6], 4294963072 }
  0x59   :  { %3233 = dma.done.wait [#allocation9], 2080  }
  0x5a   :  { %3234 = vsyncadd [#allocation9], 4294965216  ;;  %v3246_v0 = vmov 0.0   ;;  %v85_v1 = vld [vmem:[#allocation5 + $0x8] sm:$0xff]  ;;  %v84_v3 = vld [vmem:[#allocation5] sm:$0xff]  ;;  %vm158_vm0 = vcmask 261120  }
  0x5b   :  { %226 = vmatprep.mubr.f32.mxu0 %v3246_v0  ;;  %297 = vmatprep.mubr.f32.mxu1 %v3246_v0  ;;  %v93_v2 = vld [vmem:[#allocation5 + $0x48] sm:$0xff]  ;;  %v92_v5 = vld [vmem:[#allocation5 + $0x40] sm:$0xff]  ;;  %v87_v12 = vld [vmem:[#allocation5 + $0x18] sm:$0xff]  ;;  %s3247_s4 = smov 112   ;;  %v3248_v63 = vmov 0.0|0.0   ;;  %s3249_s30 = smov 80  }
  0x5c   :  { %v2575_v4 = vpack.c.bf16 %v93_v2, %v85_v1  ;;  %v101_v6 = vld [vmem:[#allocation5 + $0x88] sm:$0xff]  ;;  %v2577_v8 = vpack.c.bf16 %v92_v5, %v84_v3  ;;  %v100_v10 = vld [vmem:[#allocation5 + $0x80] sm:$0xff]  ;;  %v95_v13 = vld [vmem:[#allocation5 + $0x58] sm:$0xff]  ;;  %s3250_s6 = smov 96   ;;  %vm3251_vm1 = vmmov 0   ;;  %vm470_vm2 = vcmask 523264  }
  0x5d   :  { %v109_v7 = vld [vmem:[#allocation5 + $0xc8] sm:$0xff]  ;;  %v108_v11 = vld [vmem:[#allocation5 + $0xc0] sm:$0xff]  ;;  %v86_v14 = vld [vmem:[#allocation5 + $0x10] sm:$0xff]  ;;  %v2583_v16 = vpack.c.bf16 %v95_v13, %v87_v12  ;;  %s3252_s3 = smov 48   ;;  %s3253_s7 = smov 32   ;;  %vm2055_vm3 = vcmask 130048  }
  0x5e   :  { %v2579_v9 = vpack.c.bf16 %v109_v7, %v101_v6  ;;  %2576 = vmatprep.subr.bf16.mxu0 %v2575_v4  ;;  %v2581_v15 = vpack.c.bf16 %v108_v11, %v100_v10  ;;  %v94_v17 = vld [vmem:[#allocation5 + $0x50] sm:$0xff]  ;;  %v103_v18 = vld [vmem:[#allocation5 + $0x98] sm:$0xff]  ;;  %v89_v24 = vld [vmem:[#allocation5 + $0x28] sm:$0xff]  ;;  %vm2058_vm4 = vcmask 392192   ;;  %vm2061_vm5 = vcmask 654336  }
  0x5f   :  { %2578 = vmatpush1.bf16.msra.mxu0 %v2577_v8  ;;  %v111_v19 = vld [vmem:[#allocation5 + $0xd8] sm:$0xff]  ;;  %v2585_v20 = vpack.c.bf16 %v94_v17, %v86_v14  ;;  %v102_v22 = vld [vmem:[#allocation5 + $0x90] sm:$0xff]  ;;  %2584 = vmatprep.subr.bf16.mxu1 %v2583_v16  ;;  %v97_v26 = vld [vmem:[#allocation5 + $0x68] sm:$0xff]  ;;  %vm2063_vm6 = vcmask 785408   ;;  %vm2065_vm7 = vcmask 916480  }
  0x60   :  { %2580 = vmatprep.subr.bf16.mxu0 %v2579_v9  ;;  %v2587_v21 = vpack.c.bf16 %v111_v19, %v103_v18  ;;  %v110_v23 = vld [vmem:[#allocation5 + $0xd0] sm:$0xff]  ;;  %v3349_v25 = vld [vmem:[#allocation2] sm:$0xff]  ;;  %v88_v27 = vld [vmem:[#allocation5 + $0x20] sm:$0xff]  ;;  %v2591_v30 = vpack.c.bf16 %v97_v26, %v89_v24 }
  0x61   :  { %v96_v28 = vld [vmem:[#allocation5 + $0x60] sm:$0xff]  ;;  %2586 = vmatpush1.bf16.msra.mxu1 %v2585_v20  ;;  %v2589_v29 = vpack.c.bf16 %v110_v23, %v102_v22  ;;  %v105_v31 = vld [vmem:[#allocation5 + $0xa8] sm:$0xff]  ;;  %v91_v36 = vld [vmem:[#allocation5 + $0x38] sm:$0xff]  ;;  %v118_v20 = vlaneseq }
  0x62   :  { %v113_v32 = vld [vmem:[#allocation5 + $0xe8] sm:$0xff]  ;;  %v104_v33 = vld [vmem:[#allocation5 + $0xa0] sm:$0xff]  ;;  %2588 = vmatprep.subr.bf16.mxu1 %v2587_v21  ;;  %v2593_v34 = vpack.c.bf16 %v96_v28, %v88_v27  ;;  %v99_v37 = vld [vmem:[#allocation5 + $0x78] sm:$0xff] }
  0x63   :  { %2582 = vmatpush1.bf16.msra.mxu0 %v2581_v15  ;;  %v112_v35 = vld [vmem:[#allocation5 + $0xe0] sm:$0xff]  ;;  %v2595_v38 = vpack.c.bf16 %v113_v32, %v105_v31  ;;  %v2599_v39 = vpack.c.bf16 %v99_v37, %v91_v36  ;;  %v462_v40 = vld [vmem:[#allocation8 + $0x40] sm:$0xff]  ;;  %v464_v41 = vld [vmem:[#allocation8 + $0x50] sm:$0xff]  ;;  %v3407_v22 = vshrl.u32 %v118_v20, 7 }
  0x64   :  { %2592 = vmatprep.subr.bf16.mxu0 %v2591_v30  ;;  %v454_v42 = vld [vmem:[#allocation8] sm:$0xff]  ;;  %v3351_v43 = vpack.i.bf16 %v464_v41, %v462_v40  ;;  %v456_v44 = vld [vmem:[#allocation8 + $0x10] sm:$0xff]  ;;  %v90_v45 = vld [vmem:[#allocation5 + $0x30] sm:$0xff]  ;;  %v2597_v52 = vpack.c.bf16 %v112_v35, %v104_v33  ;;  %v2614_v2 = vpack.c.bf16 %v464_v41, %v462_v40 }
  0x65   :  { %v98_v46 = vld [vmem:[#allocation5 + $0x70] sm:$0xff]  ;;  %2590 = vmatpush1.bf16.msra.mxu1 %v2589_v29  ;;  %v3355_v47 = vpack.i.bf16 %v456_v44, %v454_v42  ;;  %v107_v49 = vld [vmem:[#allocation5 + $0xb8] sm:$0xff]  ;;  %v466_v51 = vld [vmem:[#allocation8 + $0x60] sm:$0xff]  ;;  %v2608_v62 = vpack.c.bf16 %v456_v44, %v454_v42  ;;  %v120_v23 = vsub.s32 0, %v3407_v22 }
  0x66   :  { %2107 = vmatmul.mubr.msk.f32.vlgmr.msra.gmra.mrb[0].mxu0 %vm158_vm0, %v3349_v25  ;;  %v2601_v48 = vpack.c.bf16 %v98_v46, %v90_v45  ;;  %v115_v50 = vld [vmem:[#allocation5 + $0xf8] sm:$0xff]  ;;  %v458_v55 = vld [vmem:[#allocation8 + $0x20] sm:$0xff]  ;;  %2600 = vmatprep.subr.bf16.mxu1 %v2599_v39  ;;  %v106_v57 = vld [vmem:[#allocation5 + $0xb0] sm:$0xff] }
  0x67   :  { %2594 = vmatpush1.bf16.msra.mxu0 %v2593_v34  ;;  %368 = vmatprep.mubr.f32.mxu0 %v3246_v0  ;;  %v2603_v53 = vpack.c.bf16 %v115_v50, %v107_v49  ;;  %v468_v54 = vld [vmem:[#allocation8 + $0x70] sm:$0xff]  ;;  %v114_v58 = vld [vmem:[#allocation5 + $0xf0] sm:$0xff]  ;;  %v3410_v24 = vld [vmem:[#allocation7] sm:$0xff] }
  0x68   :  { %v460_v56 = vld [vmem:[#allocation8 + $0x30] sm:$0xff]  ;;  %2596 = vmatprep.subr.bf16.mxu0 %v2595_v38  ;;  %2108 = vmatmul.mubr.msk.f32.vlgmr.msra.gmra.mrb[0].mxu1 %vm158_vm0, %v3349_v25  ;;  %v3362_v59 = vpack.i.bf16 %v468_v54, %v466_v51  ;;  %v2605_v61 = vpack.c.bf16 %v114_v58, %v106_v57  ;;  %v2617_v3 = vpack.c.bf16 %v468_v54, %v466_v51 }
  0x69   :  { %2828 = vrot.lane.b32.xlu1 %v3351_v43, %s3247_s4  ;;  %2818 = vrot.lane.b32.xlu0 %v3355_v47, %s3247_s4  ;;  %v3366_v60 = vpack.i.bf16 %v460_v56, %v458_v55  ;;  %v2611_v1 = vpack.c.bf16 %v460_v56, %v458_v55  ;;  %v121_v28 = vrot.slane %v3410_v24, %v120_v23 }
  0x6a   :  { %2602 = vmatpush1.bf16.msra.mxu1 %v2601_v48  ;;  %439 = vmatprep.mubr.f32.mxu1 %v3246_v0 }
  0x6b   :  { %2598 = vmatpush1.bf16.msra.mxu0 %v2597_v52  ;;  %2604 = vmatprep.subr.bf16.mxu1 %v2603_v53 }
  0x6c   :  { %2607 = vmatprep.subr.bf16.mxu0 %v3248_v63 }
  0x6d   :  { %2833 = vrot.lane.b32.xlu1 %v3362_v59, %s3247_s4  ;;  %2823 = vrot.lane.b32.xlu0 %v3366_v60, %s3247_s4 }
  0x6e   :  { %2109 = vmatmul.mubr.msk.f32.vlgmr.msra.gmra.mrb[2].mxu0 %vm158_vm0, %v3349_v25  ;;  %2606 = vmatpush1.bf16.msra.mxu1 %v2605_v61 }
  0x6f   :  { %2609 = vmatpush3.bf16.msra.mxu0 %v2608_v62  ;;  %2619 = vmatprep.subr.bf16.mxu1 %v3248_v63 }
  0x70   :  { %2610 = vmatprep.subr.bf16.mxu0 %v3248_v63  ;;  %2287 = vmatprep.mubr.msk.f32.mxu0 %vm3251_vm1, %v3246_v0 }
  0x71   :  { %2843 = vrot.lane.b32.xlu1 %v3355_v47, %s3249_s30  ;;  %2110 = vmatmul.mubr.msk.f32.vlgmr.msra.gmra.mrb[2].mxu1 %vm158_vm0, %v3349_v25  ;;  %v124_v25 = vsub.s32 1, %v3407_v22 }
  0x72   :  { %2838 = vrot.lane.b32.xlu0 %v3355_v47, %s3250_s6  ;;  %2306 = vmatprep.mubr.msk.f32.mxu1 %vm3251_vm1, %v3246_v0 }
  0x73   :  { %2612 = vmatpush3.bf16.msra.mxu0 %v2611_v1  ;;  %v125_v31 = vrot.slane %v3410_v24, %v124_v25 }
  0x74   :  { %2613 = vmatprep.subr.bf16.mxu0 %v3248_v63 }
  0x75   :  { %2848 = vrot.lane.b32.xlu1 %v3366_v60, %s3250_s6 }
  0x76   :  { %2853 = vrot.lane.b32.xlu0 %v3366_v60, %s3249_s30 }
  0x77   :  { %2615 = vmatpush3.bf16.msra.mxu0 %v2614_v2  ;;  %v128_v2 = vsub.s32 2, %v3407_v22 }
  0x78   :  { %2616 = vmatprep.subr.bf16.mxu0 %v3248_v63 }
  0x79   :  { %2858 = vrot.lane.b32.xlu1 %v3351_v43, %s3250_s6 }
  0x7b   :  { %2618 = vmatpush3.bf16.msra.mxu0 %v2617_v3  ;;  %v129_v3 = vrot.slane %v3410_v24, %v128_v2 }
  0x7c   :  { %2631 = vmatprep.subr.bf16.mxu0 %v3248_v63 }
  0x7d   :  { %2868 = vrot.lane.b32.xlu1 %v3362_v59, %s3250_s6 }
  0x81   :  { %2878 = vrot.lane.b32.xlu1 %v3355_v47, %s3239_s29 }
  0xdb   :  { %v2819_v4 = vpop.permute.xlu0 %2818  ;;  %v2829_v7 = vpop.permute.xlu1 %2828 }
  0xdc   :  { %v2821_v5 = vunpack.i.h.bf16 %v2819_v4  ;;  %v2820_v6 = vunpack.i.l.bf16 %v2819_v4  ;;  %v2831_v10 = vunpack.i.h.bf16 %v2829_v7  ;;  %v2830_v11 = vunpack.i.l.bf16 %v2829_v7 }
  0xde   :  { %v2620_v8 = vpack.c.bf16 %v2821_v5, %v2820_v6  ;;  %v2626_v16 = vpack.c.bf16 %v2831_v10, %v2830_v11  ;;  %v3470_v5 = vld [vmem:[#allocation8 + $0x8] sm:$0xff]  ;;  %v3472_v6 = vld [vmem:[#allocation8 + $0x18] sm:$0xff] }
  0xdf   :  { %v2824_v9 = vpop.permute.xlu0 %2823  ;;  %v2834_v15 = vpop.permute.xlu1 %2833  ;;  %v3483_v10 = vld [vmem:[#allocation8 + $0x38] sm:$0xff] }
  0xe0   :  { %v2826_v12 = vunpack.i.h.bf16 %v2824_v9  ;;  %v2825_v13 = vunpack.i.l.bf16 %v2824_v9  ;;  %2621 = vmatpush3.bf16.msra.mxu1 %v2620_v8  ;;  %v2836_v17 = vunpack.i.h.bf16 %v2834_v15  ;;  %v2835_v18 = vunpack.i.l.bf16 %v2834_v15  ;;  %v3481_v9 = vld [vmem:[#allocation8 + $0x28] sm:$0xff] }
  0xe1   :  { %2622 = vmatprep.subr.bf16.mxu1 %v3248_v63  ;;  %v2957_v8 = vpack.i.bf16 %v3472_v6, %v3470_v5  ;;  %v2962_v11 = vpack.i.bf16 %v3483_v10, %v3481_v9 }
  0xe2   :  { %v2623_v14 = vpack.c.bf16 %v2826_v12, %v2825_v13  ;;  %v2629_v19 = vpack.c.bf16 %v2836_v17, %v2835_v18  ;;  %v3492_v12 = vld [vmem:[#allocation8 + $0x68] sm:$0xff]  ;;  %v3494_v13 = vld [vmem:[#allocation8 + $0x78] sm:$0xff] }
  0xe3   :  { %v3405_v21 = vpop.permute.xlu1 %2843  ;;  %v3513_v17 = vld [vmem:[#allocation8 + $0x58] sm:$0xff] }
  0xe4   :  { %2624 = vmatpush3.bf16.msra.mxu1 %v2623_v14  ;;  %v2839_v26 = vpop.permute.xlu0 %2838  ;;  %v2972_v14 = vpack.i.bf16 %v3494_v13, %v3492_v12 }
  0xe5   :  { %2625 = vmatprep.subr.bf16.mxu1 %v3248_v63  ;;  %v2841_v29 = vunpack.i.h.bf16 %v2839_v26  ;;  %v2840_v30 = vunpack.i.l.bf16 %v2839_v26 }
  0xe7   :  { %v2849_v27 = vpop.permute.xlu1 %2848  ;;  %v2632_v36 = vpack.c.bf16 %v2841_v29, %v2840_v30 }
  0xe8   :  { %2627 = vmatpush3.bf16.msra.mxu1 %v2626_v16  ;;  %v2851_v38 = vunpack.i.h.bf16 %v2849_v27  ;;  %v2850_v39 = vunpack.i.l.bf16 %v2849_v27 }
  0xe9   :  { %2628 = vmatprep.subr.bf16.mxu1 %v3248_v63 }
  0xea   :  { %v2635_v45 = vpack.c.bf16 %v2851_v38, %v2850_v39  ;;  %v2846_v39 = vunpack.i.h.bf16 %v3405_v21 }
  0xeb   :  { %v2859_v35 = vpop.permute.xlu1 %2858 }
  0xec   :  { %2630 = vmatpush3.bf16.msra.mxu1 %v2629_v19  ;;  %v2861_v46 = vunpack.i.h.bf16 %v2859_v35  ;;  %v2860_v48 = vunpack.i.l.bf16 %v2859_v35  ;;  %v136_v19 = vsub.s32 4, %v3407_v22 }
  0xed   :  { %2643 = vmatprep.subr.bf16.mxu1 %v3248_v63 }
  0xee   :  { %v2638_v52 = vpack.c.bf16 %v2861_v46, %v2860_v48  ;;  %v137_v20 = vrot.slane %v3410_v24, %v136_v19 }
  0xef   :  { %v2869_v49 = vpop.permute.xlu1 %2868 }
  0xf0   :  { %v2871_v53 = vunpack.i.h.bf16 %v2869_v49  ;;  %v2870_v54 = vunpack.i.l.bf16 %v2869_v49 }
  0xf2   :  { %v2641_v58 = vpack.c.bf16 %v2871_v53, %v2870_v54 }
  0xf3   :  { %v2879_v57 = vpop.permute.xlu1 %2878 }
  0xf4   :  { %v2881_v61 = vunpack.i.h.bf16 %v2879_v57  ;;  %v2880_v62 = vunpack.i.l.bf16 %v2879_v57 }
  0xf6   :  { %v2656_v1 = vpack.c.bf16 %v2881_v61, %v2880_v62 }
 0x139   :  { %v228_v32 = vpop.f32.mrb[0].mxu0 }
 0x13a   :  { %v229_v33 = vadd.f32 %v228_v32, %v121_v28  ;;  %v230_v34 = vpop.f32.mrb[1].mxu0  ;;  %v148_v32 = vsub.s32 7, %v3407_v22 }
 0x13b   :  { %v231_v37 = vadd.f32 %v230_v34, %v125_v31  ;;  %v299_v41 = vpop.f32.mrb[0].mxu1  ;;  %v144_v31 = vsub.s32 6, %v3407_v22 }
 0x13c   :  { %v446_v40 = vmax.f32 %v229_v33, 0.0  ;;  %v3419_v44 = vpop.f32.mrb[1].mxu1  ;;  %v3466_v4 = vadd.f32 %v299_v41, %v129_v3  ;;  %v149_v34 = vrot.slane %v3410_v24, %v148_v32 }
 0x13d   :  { %v447_v42 = vmax.f32 %v231_v37, 0.0  ;;  %v145_v33 = vrot.slane %v3410_v24, %v144_v31 }
 0x13e   :  { %544 = vrot.lane.b32.xlu0 %v446_v40, %s3239_s29  ;;  %2288 = vmatmul.mubr.msk.f32.vlgmr.msra.gmra.mrb[4].mxu0 %vm470_vm2, %v446_v40  ;;  %v448_v7 = vmax.f32 %v3466_v4, 0.0  ;;  %v2845_v40 = vunpack.i.l.bf16 %v3405_v21 }
 0x13f   :  { %2633 = vmatpush3.bf16.msra.mxu0 %v2632_v36  ;;  %747 = vrot.lane.b32.xlu1 %v447_v42, %s3239_s29 }
 0x140   :  { %2634 = vmatprep.subr.bf16.mxu0 %v3248_v63  ;;  %2325 = vmatprep.mubr.msk.f32.mxu0 %vm3251_vm1, %v3246_v0  ;;  %v2644_v41 = vpack.c.bf16 %v2846_v39, %v2845_v40 }
 0x141   :  { %v3427_v50 = vpop.f32.mrb[2].mxu0 }
 0x142   :  { %2863 = vrot.lane.b32.xlu0 %v3351_v43, %s3249_s30  ;;  %v3431_v51 = vpop.f32.mrb[3].mxu0  ;;  %v3530_v27 = vadd.f32 %v3427_v50, %v137_v20 }
 0x143   :  { %2636 = vmatpush3.bf16.msra.mxu0 %v2635_v45  ;;  %2893 = vrot.lane.b32.xlu1 %v3366_v60, %s3252_s3 }
 0x144   :  { %2637 = vmatprep.subr.bf16.mxu0 %v3248_v63  ;;  %v3436_v55 = vpop.f32.mrb[2].mxu1  ;;  %v450_v29 = vmax.f32 %v3530_v27, 0.0 }
 0x145   :  { %v3440_v56 = vpop.f32.mrb[3].mxu1  ;;  %v3562_v35 = vadd.f32 %v3436_v55, %v145_v33 }
 0x146   :  { %2873 = vrot.lane.b32.xlu0 %v3362_v59, %s3249_s30  ;;  %v3566_v36 = vadd.f32 %v3440_v56, %v149_v34 }
 0x147   :  { %2639 = vmatpush3.bf16.msra.mxu0 %v2638_v52  ;;  %2903 = vrot.lane.b32.xlu1 %v3351_v43, %s3252_s3  ;;  %v452_v37 = vmax.f32 %v3562_v35, 0.0 }
 0x148   :  { %2640 = vmatprep.subr.bf16.mxu0 %v3248_v63  ;;  %v453_v38 = vmax.f32 %v3566_v36, 0.0 }
 0x14a   :  { %2883 = vrot.lane.b32.xlu0 %v3355_v47, %s3252_s3 }
 0x14b   :  { %2642 = vmatpush3.bf16.msra.mxu0 %v2641_v58  ;;  %2913 = vrot.lane.b32.xlu1 %v3362_v59, %s3252_s3 }
 0x14c   :  { %2655 = vmatprep.subr.bf16.mxu0 %v3248_v63 }
 0x14e   :  { %2326 = vmatmul.mubr.msk.f32.vlgmr.msra.gmra.mrb[6].mxu0 %vm470_vm2, %v447_v42  ;;  %2888 = vrot.lane.b32.xlu0 %v3366_v60, %s3239_s29 }
 0x14f   :  { %2923 = vrot.lane.b32.xlu1 %v3355_v47, %s3242_s17  ;;  %2657 = vmatpush3.bf16.msra.mxu0 %v2656_v1 }
 0x150   :  { %2658 = vmatprep.subr.bf16.mxu0 %v3248_v63  ;;  %2363 = vmatprep.mubr.msk.f32.mxu0 %vm3251_vm1, %v3246_v0 }
 0x152   :  { %2898 = vrot.lane.b32.xlu0 %v3351_v43, %s3239_s29 }
 0x153   :  { %2928 = vrot.lane.b32.xlu1 %v3366_v60, %s3253_s7 }
 0x156   :  { %2908 = vrot.lane.b32.xlu0 %v3362_v59, %s3239_s29 }
 0x157   :  { %2938 = vrot.lane.b32.xlu1 %v3351_v43, %s3253_s7 }
 0x15a   :  { %2918 = vrot.lane.b32.xlu0 %v3355_v47, %s3253_s7  ;;  %v132_v47 = vsub.s32 3, %v3407_v22 }
 0x15b   :  { %2948 = vrot.lane.b32.xlu1 %v3362_v59, %s3253_s7 }
 0x15c   :  { %v133_v15 = vrot.slane %v3410_v24, %v132_v47 }
 0x15e   :  { %942 = vrot.lane.b32.xlu0 %v448_v7, %s3239_s29  ;;  %v3506_v16 = vadd.f32 %v3419_v44, %v133_v15 }
 0x15f   :  { %2958 = vrot.lane.b32.xlu1 %v2957_v8, %s3247_s4 }
 0x160   :  { %v449_v18 = vmax.f32 %v3506_v16, 0.0 }
 0x162   :  { %2933 = vrot.lane.b32.xlu0 %v3366_v60, %s3242_s17  ;;  %v3511_v60 = vld [vmem:[#allocation8 + $0x48] sm:$0xff] }
 0x163   :  { %2963 = vrot.lane.b32.xlu1 %v2962_v11, %s3247_s4 }
 0x166   :  { %2943 = vrot.lane.b32.xlu0 %v3351_v43, %s3242_s17  ;;  %v2967_v43 = vpack.i.bf16 %v3513_v17, %v3511_v60 }
 0x167   :  { %2973 = vrot.lane.b32.xlu1 %v2972_v14, %s3247_s4 }
 0x16a   :  { %2953 = vrot.lane.b32.xlu0 %v3362_v59, %s3242_s17  ;;  %v140_v59 = vsub.s32 5, %v3407_v22 }
 0x16b   :  { %2983 = vrot.lane.b32.xlu1 %v2957_v8, %s3249_s30 }
 0x16c   :  { %v141_v26 = vrot.slane %v3410_v24, %v140_v59  ;;  %v2854_v24 = vpop.permute.xlu0 %2853 }
 0x16d   :  { %v2856_v42 = vunpack.i.h.bf16 %v2854_v24  ;;  %v2855_v44 = vunpack.i.l.bf16 %v2854_v24 }
 0x16e   :  { %1137 = vrot.lane.b32.xlu0 %v449_v18, %s3239_s29  ;;  %v3534_v28 = vadd.f32 %v3431_v51, %v141_v26 }
 0x16f   :  { %2988 = vrot.lane.b32.xlu1 %v2962_v11, %s3250_s6  ;;  %v2647_v48 = vpack.c.bf16 %v2856_v42, %v2855_v44 }
 0x170   :  { %v451_v30 = vmax.f32 %v3534_v28, 0.0 }
 0x172   :  { %2968 = vrot.lane.b32.xlu0 %v2967_v43, %s3247_s4 }
 0x173   :  { %2998 = vrot.lane.b32.xlu1 %v2967_v43, %s3250_s6 }
 0x176   :  { %2978 = vrot.lane.b32.xlu0 %v2957_v8, %s3250_s6 }
 0x177   :  { %3008 = vrot.lane.b32.xlu1 %v2972_v14, %s3250_s6 }
 0x17a   :  { %2993 = vrot.lane.b32.xlu0 %v2962_v11, %s3249_s30 }
 0x17b   :  { %3018 = vrot.lane.b32.xlu1 %v2957_v8, %s3239_s29 }
 0x17e   :  { %1308 = vrot.lane.b32.xlu0 %v450_v29, %s3239_s29 }
 0x17f   :  { %1511 = vrot.lane.b32.xlu1 %v451_v30, %s3239_s29 }
 0x182   :  { %3003 = vrot.lane.b32.xlu0 %v2967_v43, %s3249_s30 }
 0x183   :  { %3033 = vrot.lane.b32.xlu1 %v2962_v11, %s3252_s3 }
 0x186   :  { %3013 = vrot.lane.b32.xlu0 %v2972_v14, %s3249_s30 }
 0x187   :  { %3043 = vrot.lane.b32.xlu1 %v2967_v43, %s3252_s3 }
 0x18a   :  { %3023 = vrot.lane.b32.xlu0 %v2957_v8, %s3252_s3 }
 0x18b   :  { %3053 = vrot.lane.b32.xlu1 %v2972_v14, %s3252_s3 }
 0x18e   :  { %3028 = vrot.lane.b32.xlu0 %v2962_v11, %s3239_s29 }
 0x18f   :  { %3063 = vrot.lane.b32.xlu1 %v2957_v8, %s3242_s17 }
 0x192   :  { %3038 = vrot.lane.b32.xlu0 %v2967_v43, %s3239_s29 }
 0x193   :  { %3068 = vrot.lane.b32.xlu1 %v2962_v11, %s3253_s7 }
 0x196   :  { %3048 = vrot.lane.b32.xlu0 %v2972_v14, %s3239_s29 }
 0x197   :  { %3078 = vrot.lane.b32.xlu1 %v2967_v43, %s3253_s7 }
 0x19a   :  { %3058 = vrot.lane.b32.xlu0 %v2957_v8, %s3253_s7 }
 0x19b   :  { %3088 = vrot.lane.b32.xlu1 %v2972_v14, %s3253_s7 }
 0x19e   :  { %1706 = vrot.lane.b32.xlu0 %v452_v37, %s3239_s29 }
 0x19f   :  { %1901 = vrot.lane.b32.xlu1 %v453_v38, %s3239_s29 }
 0x1a2   :  { %3073 = vrot.lane.b32.xlu0 %v2962_v11, %s3242_s17 }
 0x1a6   :  { %3083 = vrot.lane.b32.xlu0 %v2967_v43, %s3242_s17 }
 0x1aa   :  { %3093 = vrot.lane.b32.xlu0 %v2972_v14, %s3242_s17 }
 0x1b0   :  { %v545_v45 = vpop.permute.xlu0 %544 }
 0x1b1   :  { %v748_v46 = vpop.permute.xlu1 %747  ;;  %2307 = vmatmul.mubr.msk.f32.vlgmr.msra.gmra.mrb[4].mxu1 %vm470_vm2, %v545_v45 }
 0x1b2   :  { %2645 = vmatpush3.bf16.msra.mxu1 %v2644_v41  ;;  %2344 = vmatprep.mubr.msk.f32.mxu1 %vm3251_vm1, %v3246_v0 }
 0x1b3   :  { %2646 = vmatprep.subr.bf16.mxu1 %v3248_v63 }
 0x1b4   :  { %v2864_v49 = vpop.permute.xlu0 %2863 }
 0x1b5   :  { %v2866_v50 = vunpack.i.h.bf16 %v2864_v49  ;;  %v2865_v51 = vunpack.i.l.bf16 %v2864_v49  ;;  %v2894_v52 = vpop.permute.xlu1 %2893 }
 0x1b6   :  { %2648 = vmatpush3.bf16.msra.mxu1 %v2647_v48  ;;  %v2896_v2 = vunpack.i.h.bf16 %v2894_v52  ;;  %v2895_v3 = vunpack.i.l.bf16 %v2894_v52 }
 0x1b7   :  { %v2650_v21 = vpack.c.bf16 %v2866_v50, %v2865_v51  ;;  %2649 = vmatprep.subr.bf16.mxu1 %v3248_v63 }
 0x1b8   :  { %v2874_v53 = vpop.permute.xlu0 %2873  ;;  %v2671_v43 = vpack.c.bf16 %v2896_v2, %v2895_v3 }
 0x1b9   :  { %v2876_v54 = vunpack.i.h.bf16 %v2874_v53  ;;  %v2875_v55 = vunpack.i.l.bf16 %v2874_v53  ;;  %v2904_v56 = vpop.permute.xlu1 %2903 }
 0x1ba   :  { %2651 = vmatpush3.bf16.msra.mxu1 %v2650_v21  ;;  %v2906_v19 = vunpack.i.h.bf16 %v2904_v56  ;;  %v2905_v59 = vunpack.i.l.bf16 %v2904_v56 }
 0x1bb   :  { %v2653_v57 = vpack.c.bf16 %v2876_v54, %v2875_v55  ;;  %2652 = vmatprep.subr.bf16.mxu1 %v3248_v63 }
 0x1bc   :  { %v2884_v58 = vpop.permute.xlu0 %2883  ;;  %v2674_v34 = vpack.c.bf16 %v2906_v19, %v2905_v59 }
 0x1bd   :  { %v2886_v61 = vunpack.i.h.bf16 %v2884_v58  ;;  %v2885_v62 = vunpack.i.l.bf16 %v2884_v58  ;;  %v2914_v1 = vpop.permute.xlu1 %2913 }
 0x1be   :  { %2654 = vmatpush3.bf16.msra.mxu1 %v2653_v57  ;;  %v2916_v24 = vunpack.i.h.bf16 %v2914_v1  ;;  %v2915_v39 = vunpack.i.l.bf16 %v2914_v1 }
 0x1bf   :  { %v2668_v8 = vpack.c.bf16 %v2886_v61, %v2885_v62  ;;  %2667 = vmatprep.subr.bf16.mxu1 %v3248_v63 }
 0x1c0   :  { %v2889_v11 = vpop.permute.xlu0 %2888 }
 0x1c1   :  { %v2891_v47 = vunpack.i.h.bf16 %v2889_v11  ;;  %v2890_v14 = vunpack.i.l.bf16 %v2889_v11  ;;  %2345 = vmatmul.mubr.msk.f32.vlgmr.msra.gmra.mrb[6].mxu1 %vm470_vm2, %v748_v46  ;;  %v2924_v15 = vpop.permute.xlu1 %2923  ;;  %v2677_v46 = vpack.c.bf16 %v2916_v24, %v2915_v39  ;;  %v2704_v39 = vpack.c.bf16 %v3472_v6, %v3470_v5 }
 0x1c2   :  { %2669 = vmatpush3.bf16.msra.mxu1 %v2668_v8  ;;  %2382 = vmatprep.mubr.msk.f32.mxu1 %vm3251_vm1, %v3246_v0  ;;  %v2926_v48 = vunpack.i.h.bf16 %v2924_v15  ;;  %v2925_v49 = vunpack.i.l.bf16 %v2924_v15 }
 0x1c3   :  { %v2659_v20 = vpack.c.bf16 %v2891_v47, %v2890_v14  ;;  %2670 = vmatprep.subr.bf16.mxu1 %v3248_v63 }
 0x1c4   :  { %v2899_v26 = vpop.permute.xlu0 %2898  ;;  %v2692_v56 = vpack.c.bf16 %v2926_v48, %v2925_v49 }
 0x1c5   :  { %v2901_v31 = vunpack.i.h.bf16 %v2899_v26  ;;  %v2900_v32 = vunpack.i.l.bf16 %v2899_v26  ;;  %v2929_v33 = vpop.permute.xlu1 %2928  ;;  %2660 = vmatpush3.bf16.msra.mxu0 %v2659_v20 }
 0x1c6   :  { %2672 = vmatpush3.bf16.msra.mxu1 %v2671_v43  ;;  %2661 = vmatprep.subr.bf16.mxu0 %v3248_v63  ;;  %v2931_v52 = vunpack.i.h.bf16 %v2929_v33  ;;  %v2930_v21 = vunpack.i.l.bf16 %v2929_v33 }
 0x1c7   :  { %v2662_v40 = vpack.c.bf16 %v2901_v31, %v2900_v32  ;;  %2673 = vmatprep.subr.bf16.mxu1 %v3248_v63 }
 0x1c8   :  { %v2909_v41 = vpop.permute.xlu0 %2908  ;;  %v2683_v1 = vpack.c.bf16 %v2931_v52, %v2930_v21  ;;  %v2713_v21 = vpack.c.bf16 %v3494_v13, %v3492_v12 }
 0x1c9   :  { %v2911_v42 = vunpack.i.h.bf16 %v2909_v41  ;;  %v2910_v44 = vunpack.i.l.bf16 %v2909_v41  ;;  %v2939_v45 = vpop.permute.xlu1 %2938  ;;  %2663 = vmatpush3.bf16.msra.mxu0 %v2662_v40 }
 0x1ca   :  { %2675 = vmatpush3.bf16.msra.mxu1 %v2674_v34  ;;  %2664 = vmatprep.subr.bf16.mxu0 %v3248_v63  ;;  %v2941_v58 = vunpack.i.h.bf16 %v2939_v45  ;;  %v2940_v61 = vunpack.i.l.bf16 %v2939_v45 }
 0x1cb   :  { %v2665_v50 = vpack.c.bf16 %v2911_v42, %v2910_v44  ;;  %2676 = vmatprep.subr.bf16.mxu1 %v3248_v63 }
 0x1cc   :  { %v2919_v51 = vpop.permute.xlu0 %2918  ;;  %v2686_v3 = vpack.c.bf16 %v2941_v58, %v2940_v61 }
 0x1cd   :  { %v2921_v53 = vunpack.i.h.bf16 %v2919_v51  ;;  %v2920_v54 = vunpack.i.l.bf16 %v2919_v51  ;;  %v2949_v55 = vpop.permute.xlu1 %2948  ;;  %2666 = vmatpush3.bf16.msra.mxu0 %v2665_v50 }
 0x1ce   :  { %2678 = vmatpush3.bf16.msra.mxu1 %v2677_v46  ;;  %2679 = vmatprep.subr.bf16.mxu0 %v3248_v63  ;;  %v2951_v4 = vunpack.i.h.bf16 %v2949_v55  ;;  %v2707_v46 = vpack.c.bf16 %v3483_v10, %v3481_v9 }
 0x1cf   :  { %v2680_v57 = vpack.c.bf16 %v2921_v53, %v2920_v54  ;;  %2691 = vmatprep.subr.bf16.mxu1 %v3248_v63 }
 0x1d0   :  { %v943_v62 = vpop.permute.xlu0 %942  ;;  %2364 = vmatmul.mubr.msk.f32.vlgmr.msra.gmra.mrb[8].mxu0 %vm470_vm2, %v448_v7  ;;  %v2950_v7 = vunpack.i.l.bf16 %v2949_v55 }
 0x1d1   :  { %v2959_v2 = vpop.permute.xlu1 %2958  ;;  %2383 = vmatmul.mubr.msk.f32.vlgmr.msra.gmra.mrb[8].mxu1 %vm470_vm2, %v943_v62  ;;  %2681 = vmatpush3.bf16.msra.mxu0 %v2680_v57 }
 0x1d2   :  { %2693 = vmatpush3.bf16.msra.mxu1 %v2692_v56  ;;  %2682 = vmatprep.subr.bf16.mxu0 %v3248_v63  ;;  %v2689_v19 = vpack.c.bf16 %v2951_v4, %v2950_v7  ;;  %v2961_v40 = vunpack.i.h.bf16 %v2959_v2  ;;  %v2960_v41 = vunpack.i.l.bf16 %v2959_v2 }
 0x1d3   :  { %2694 = vmatprep.subr.bf16.mxu1 %v3248_v63  ;;  %2401 = vmatprep.mubr.msk.f32.mxu0 %vm3251_vm1, %v3246_v0 }
 0x1d4   :  { %v2934_v8 = vpop.permute.xlu0 %2933  ;;  %2420 = vmatprep.mubr.msk.f32.mxu1 %vm3251_vm1, %v3246_v0  ;;  %v2716_v5 = vpack.c.bf16 %v2961_v40, %v2960_v41 }
 0x1d5   :  { %v2936_v11 = vunpack.i.h.bf16 %v2934_v8  ;;  %v2935_v47 = vunpack.i.l.bf16 %v2934_v8  ;;  %v2964_v14 = vpop.permute.xlu1 %2963  ;;  %2684 = vmatpush3.bf16.msra.mxu0 %v2683_v1 }
 0x1d6   :  { %2685 = vmatprep.subr.bf16.mxu0 %v3248_v63  ;;  %v2966_v6 = vunpack.i.h.bf16 %v2964_v14  ;;  %v2965_v48 = vunpack.i.l.bf16 %v2964_v14 }
 0x1d7   :  { %v2695_v15 = vpack.c.bf16 %v2936_v11, %v2935_v47 }
 0x1d8   :  { %v2944_v43 = vpop.permute.xlu0 %2943  ;;  %v2719_v9 = vpack.c.bf16 %v2966_v6, %v2965_v48 }
 0x1d9   :  { %v2946_v59 = vunpack.i.h.bf16 %v2944_v43  ;;  %v2945_v20 = vunpack.i.l.bf16 %v2944_v43  ;;  %v3611_v26 = vpop.permute.xlu1 %2973  ;;  %2687 = vmatpush3.bf16.msra.mxu0 %v2686_v3  ;;  %2696 = vmatpush3.bf16.msra.mxu1 %v2695_v15 }
 0x1da   :  { %2688 = vmatprep.subr.bf16.mxu0 %v3248_v63  ;;  %2697 = vmatprep.subr.bf16.mxu1 %v3248_v63  ;;  %v2976_v53 = vunpack.i.h.bf16 %v3611_v26 }
 0x1db   :  { %v2698_v31 = vpack.c.bf16 %v2946_v59, %v2945_v20 }
 0x1dc   :  { %v2954_v32 = vpop.permute.xlu0 %2953 }
 0x1dd   :  { %v2956_v33 = vunpack.i.h.bf16 %v2954_v32  ;;  %v2955_v34 = vunpack.i.l.bf16 %v2954_v32  ;;  %v3615_v24 = vpop.permute.xlu1 %2983  ;;  %2690 = vmatpush3.bf16.msra.mxu0 %v2689_v19  ;;  %2699 = vmatpush3.bf16.msra.mxu1 %v2698_v31 }
 0x1de   :  { %2700 = vmatprep.subr.bf16.mxu1 %v3248_v63  ;;  %2703 = vmatprep.subr.bf16.mxu0 %v3248_v63  ;;  %v2986_v58 = vunpack.i.h.bf16 %v3615_v24  ;;  %v2985_v61 = vunpack.i.l.bf16 %v3615_v24 }
 0x1df   :  { %v2701_v42 = vpack.c.bf16 %v2956_v33, %v2955_v34 }
 0x1e0   :  { %v1138_v44 = vpop.permute.xlu0 %1137  ;;  %2402 = vmatmul.mubr.msk.f32.vlgmr.msra.gmra.mrb[10].mxu0 %vm470_vm2, %v449_v18  ;;  %v2710_v18 = vpack.c.bf16 %v3513_v17, %v3511_v60  ;;  %v2975_v60 = vunpack.i.l.bf16 %v3611_v26  ;;  %v2740_v8 = vpack.c.bf16 %v2986_v58, %v2985_v61 }
 0x1e1   :  { %v2989_v45 = vpop.permute.xlu1 %2988  ;;  %2702 = vmatpush3.bf16.msra.mxu1 %v2701_v42  ;;  %2705 = vmatpush3.bf16.msra.mxu0 %v2704_v39 }
 0x1e2   :  { %2706 = vmatprep.subr.bf16.mxu0 %v3248_v63  ;;  %2715 = vmatprep.subr.bf16.mxu1 %v3248_v63  ;;  %v2991_v12 = vunpack.i.h.bf16 %v2989_v45  ;;  %v2990_v13 = vunpack.i.l.bf16 %v2989_v45  ;;  %v2725_v62 = vpack.c.bf16 %v2976_v53, %v2975_v60 }
 0x1e3   :  { %2439 = vmatprep.mubr.msk.f32.mxu0 %vm3251_vm1, %v3246_v0 }
 0x1e4   :  { %v2969_v49 = vpop.permute.xlu0 %2968  ;;  %2421 = vmatmul.mubr.msk.f32.vlgmr.msra.gmra.mrb[10].mxu1 %vm470_vm2, %v1138_v44  ;;  %v2731_v4 = vpack.c.bf16 %v2991_v12, %v2990_v13 }
 0x1e5   :  { %v2999_v16 = vpop.permute.xlu1 %2998  ;;  %2708 = vmatpush3.bf16.msra.mxu0 %v2707_v46  ;;  %2717 = vmatpush3.bf16.msra.mxu1 %v2716_v5  ;;  %v2971_v10 = vunpack.i.h.bf16 %v2969_v49  ;;  %v2970_v50 = vunpack.i.l.bf16 %v2969_v49 }
 0x1e6   :  { %2709 = vmatprep.subr.bf16.mxu0 %v3248_v63  ;;  %2718 = vmatprep.subr.bf16.mxu1 %v3248_v63  ;;  %v3001_v7 = vunpack.i.h.bf16 %v2999_v16  ;;  %v3000_v11 = vunpack.i.l.bf16 %v2999_v16 }
 0x1e7   :  { %2458 = vmatprep.mubr.msk.f32.mxu1 %vm3251_vm1, %v3246_v0  ;;  %v2722_v17 = vpack.c.bf16 %v2971_v10, %v2970_v50 }
 0x1e8   :  { %v2979_v51 = vpop.permute.xlu0 %2978  ;;  %v2734_v19 = vpack.c.bf16 %v3001_v7, %v3000_v11 }
 0x1e9   :  { %v3009_v52 = vpop.permute.xlu1 %3008  ;;  %2711 = vmatpush3.bf16.msra.mxu0 %v2710_v18  ;;  %2720 = vmatpush3.bf16.msra.mxu1 %v2719_v9  ;;  %v2981_v54 = vunpack.i.h.bf16 %v2979_v51  ;;  %v2980_v55 = vunpack.i.l.bf16 %v2979_v51 }
 0x1ea   :  { %2712 = vmatprep.subr.bf16.mxu0 %v3248_v63  ;;  %2721 = vmatprep.subr.bf16.mxu1 %v3248_v63  ;;  %v3011_v15 = vunpack.i.h.bf16 %v3009_v52  ;;  %v3010_v43 = vunpack.i.l.bf16 %v3009_v52 }
 0x1eb   :  { %v2728_v1 = vpack.c.bf16 %v2981_v54, %v2980_v55 }
 0x1ec   :  { %v2994_v56 = vpop.permute.xlu0 %2993  ;;  %v2737_v33 = vpack.c.bf16 %v3011_v15, %v3010_v43 }
 0x1ed   :  { %v3019_v57 = vpop.permute.xlu1 %3018  ;;  %2714 = vmatpush3.bf16.msra.mxu0 %v2713_v21  ;;  %2723 = vmatpush3.bf16.msra.mxu1 %v2722_v17  ;;  %v2996_v47 = vunpack.i.h.bf16 %v2994_v56  ;;  %v2995_v14 = vunpack.i.l.bf16 %v2994_v56 }
 0x1ee   :  { %2724 = vmatprep.subr.bf16.mxu1 %v3248_v63  ;;  %2727 = vmatprep.subr.bf16.mxu0 %v3248_v63  ;;  %v3021_v34 = vunpack.i.h.bf16 %v3019_v57  ;;  %v3020_v24 = vunpack.i.l.bf16 %v3019_v57 }
 0x1ef   :  { %v2743_v59 = vpack.c.bf16 %v2996_v47, %v2995_v14 }
 0x1f0   :  { %v1309_v2 = vpop.permute.xlu0 %1308  ;;  %2440 = vmatmul.mubr.msk.f32.vlgmr.msra.gmra.mrb[12].mxu0 %vm470_vm2, %v450_v29  ;;  %v2752_v45 = vpack.c.bf16 %v3021_v34, %v3020_v24 }
 0x1f1   :  { %v3650_v3 = vpop.permute.xlu1 %1511  ;;  %2726 = vmatpush3.bf16.msra.mxu1 %v2725_v62  ;;  %2729 = vmatpush3.bf16.msra.mxu0 %v2728_v1 }
 0x1f2   :  { %2730 = vmatprep.subr.bf16.mxu0 %v3248_v63  ;;  %2739 = vmatprep.subr.bf16.mxu1 %v3248_v63 }
 0x1f3   :  { %2477 = vmatprep.mubr.msk.f32.mxu0 %vm3251_vm1, %v3246_v0 }
 0x1f4   :  { %v3004_v27 = vpop.permute.xlu0 %3003  ;;  %2459 = vmatmul.mubr.msk.f32.vlgmr.msra.gmra.mrb[12].mxu1 %vm470_vm2, %v1309_v2 }
 0x1f5   :  { %2732 = vmatpush3.bf16.msra.mxu0 %v2731_v4  ;;  %2741 = vmatpush3.bf16.msra.mxu1 %v2740_v8  ;;  %v3034_v29 = vpop.permute.xlu1 %3033  ;;  %v3006_v20 = vunpack.i.h.bf16 %v3004_v27  ;;  %v3005_v26 = vunpack.i.l.bf16 %v3004_v27 }
 0x1f6   :  { %2733 = vmatprep.subr.bf16.mxu0 %v3248_v63  ;;  %2742 = vmatprep.subr.bf16.mxu1 %v3248_v63  ;;  %v3036_v10 = vunpack.i.h.bf16 %v3034_v29  ;;  %v3035_v50 = vunpack.i.l.bf16 %v3034_v29 }
 0x1f7   :  { %2496 = vmatprep.mubr.msk.f32.mxu1 %vm3251_vm1, %v3246_v0  ;;  %v2746_v39 = vpack.c.bf16 %v3006_v20, %v3005_v26 }
 0x1f8   :  { %v3014_v31 = vpop.permute.xlu0 %3013  ;;  %v2767_v53 = vpack.c.bf16 %v3036_v10, %v3035_v50 }
 0x1f9   :  { %2735 = vmatpush3.bf16.msra.mxu0 %v2734_v19  ;;  %2744 = vmatpush3.bf16.msra.mxu1 %v2743_v59  ;;  %v3044_v32 = vpop.permute.xlu1 %3043  ;;  %v3016_v40 = vunpack.i.h.bf16 %v3014_v31  ;;  %v3015_v41 = vunpack.i.l.bf16 %v3014_v31 }
 0x1fa   :  { %2736 = vmatprep.subr.bf16.mxu0 %v3248_v63  ;;  %2745 = vmatprep.subr.bf16.mxu1 %v3248_v63  ;;  %v3046_v60 = vunpack.i.h.bf16 %v3044_v32  ;;  %v3045_v17 = vunpack.i.l.bf16 %v3044_v32 }
 0x1fb   :  { %v2749_v46 = vpack.c.bf16 %v3016_v40, %v3015_v41 }
 0x1fc   :  { %v3024_v42 = vpop.permute.xlu0 %3023  ;;  %v2770_v58 = vpack.c.bf16 %v3046_v60, %v3045_v17 }
 0x1fd   :  { %2738 = vmatpush3.bf16.msra.mxu0 %v2737_v33  ;;  %2747 = vmatpush3.bf16.msra.mxu1 %v2746_v39  ;;  %v3054_v44 = vpop.permute.xlu1 %3053  ;;  %v3026_v5 = vunpack.i.h.bf16 %v3024_v42  ;;  %v3025_v6 = vunpack.i.l.bf16 %v3024_v42 }
 0x1fe   :  { %2748 = vmatprep.subr.bf16.mxu1 %v3248_v63  ;;  %2751 = vmatprep.subr.bf16.mxu0 %v3248_v63  ;;  %v3056_v61 = vunpack.i.h.bf16 %v3054_v44  ;;  %v3055_v12 = vunpack.i.l.bf16 %v3054_v44 }
 0x1ff   :  { %v2764_v9 = vpack.c.bf16 %v3026_v5, %v3025_v6 }
 0x200   :  { %v3029_v48 = vpop.permute.xlu0 %3028  ;;  %2478 = vmatmul.mubr.msk.f32.vlgmr.msra.gmra.mrb[14].mxu0 %vm470_vm2, %v451_v30  ;;  %v2773_v7 = vpack.c.bf16 %v3056_v61, %v3055_v12 }
 0x201   :  { %v3031_v49 = vunpack.i.h.bf16 %v3029_v48  ;;  %v3030_v16 = vunpack.i.l.bf16 %v3029_v48  ;;  %2750 = vmatpush3.bf16.msra.mxu1 %v2749_v46  ;;  %2753 = vmatpush3.bf16.msra.mxu0 %v2752_v45  ;;  %v3064_v18 = vpop.permute.xlu1 %3063 }
 0x202   :  { %2754 = vmatprep.subr.bf16.mxu0 %v3248_v63  ;;  %2763 = vmatprep.subr.bf16.mxu1 %v3248_v63  ;;  %v3066_v11 = vunpack.i.h.bf16 %v3064_v18  ;;  %v3065_v47 = vunpack.i.l.bf16 %v3064_v18 }
 0x203   :  { %v2755_v51 = vpack.c.bf16 %v3031_v49, %v3030_v16  ;;  %2515 = vmatprep.mubr.msk.f32.mxu0 %vm3251_vm1, %v3246_v0 }
 0x204   :  { %v3039_v52 = vpop.permute.xlu0 %3038  ;;  %2497 = vmatmul.mubr.msk.f32.vlgmr.msra.gmra.mrb[14].mxu1 %vm470_vm2, %v3650_v3  ;;  %v2788_v26 = vpack.c.bf16 %v3066_v11, %v3065_v47 }
 0x205   :  { %v3041_v28 = vunpack.i.h.bf16 %v3039_v52  ;;  %v3040_v30 = vunpack.i.l.bf16 %v3039_v52  ;;  %2756 = vmatpush3.bf16.msra.mxu0 %v2755_v51  ;;  %2765 = vmatpush3.bf16.msra.mxu1 %v2764_v9  ;;  %v3069_v21 = vpop.permute.xlu1 %3068 }
 0x206   :  { %2757 = vmatprep.subr.bf16.mxu0 %v3248_v63  ;;  %2766 = vmatprep.subr.bf16.mxu1 %v3248_v63  ;;  %v3071_v8 = vunpack.i.h.bf16 %v3069_v21  ;;  %v3070_v4 = vunpack.i.l.bf16 %v3069_v21 }
 0x207   :  { %v2758_v54 = vpack.c.bf16 %v3041_v28, %v3040_v30  ;;  %2534 = vmatprep.mubr.msk.f32.mxu1 %vm3251_vm1, %v3246_v0 }
 0x208   :  { %v3049_v55 = vpop.permute.xlu0 %3048  ;;  %v2779_v43 = vpack.c.bf16 %v3071_v8, %v3070_v4 }
 0x209   :  { %v3051_v56 = vunpack.i.h.bf16 %v3049_v55  ;;  %v3050_v57 = vunpack.i.l.bf16 %v3049_v55  ;;  %2759 = vmatpush3.bf16.msra.mxu0 %v2758_v54  ;;  %2768 = vmatpush3.bf16.msra.mxu1 %v2767_v53  ;;  %v3079_v1 = vpop.permute.xlu1 %3078 }
 0x20a   :  { %2760 = vmatprep.subr.bf16.mxu0 %v3248_v63  ;;  %2769 = vmatprep.subr.bf16.mxu1 %v3248_v63  ;;  %v3081_v29 = vunpack.i.h.bf16 %v3079_v1  ;;  %v3080_v15 = vunpack.i.l.bf16 %v3079_v1 }
 0x20b   :  { %v2761_v13 = vpack.c.bf16 %v3051_v56, %v3050_v57 }
 0x20c   :  { %v3059_v62 = vpop.permute.xlu0 %3058  ;;  %v2782_v35 = vpack.c.bf16 %v3081_v29, %v3080_v15  ;;  %v2074_v15 = vld [vmem:[#allocation10] sm:$0x3] }
 0x20d   :  { %v3061_v2 = vunpack.i.h.bf16 %v3059_v62  ;;  %v3060_v3 = vunpack.i.l.bf16 %v3059_v62  ;;  %2762 = vmatpush3.bf16.msra.mxu0 %v2761_v13  ;;  %2771 = vmatpush3.bf16.msra.mxu1 %v2770_v58  ;;  %v3089_v20 = vpop.permute.xlu1 %3088 }
 0x20e   :  { %2772 = vmatprep.subr.bf16.mxu1 %v3248_v63  ;;  %2775 = vmatprep.subr.bf16.mxu0 %v3248_v63  ;;  %v3091_v33 = vunpack.i.h.bf16 %v3089_v20  ;;  %v3090_v34 = vunpack.i.l.bf16 %v3089_v20 }
 0x20f   :  { %v2776_v14 = vpack.c.bf16 %v3061_v2, %v3060_v3 }
 0x210   :  { %v1707_v27 = vpop.permute.xlu0 %1706  ;;  %2516 = vmatmul.mubr.msk.f32.vlgmr.msra.gmra.mrb[16].mxu0 %vm470_vm2, %v452_v37  ;;  %v2785_v40 = vpack.c.bf16 %v3091_v33, %v3090_v34 }
 0x211   :  { %v3685_v19 = vpop.f32.mrb[4].mxu0  ;;  %2774 = vmatpush3.bf16.msra.mxu1 %v2773_v7  ;;  %2777 = vmatpush3.bf16.msra.mxu0 %v2776_v14  ;;  %v1902_v49 = vpop.permute.xlu1 %1901 }
 0x212   :  { %v2289_v59 = vpop.f32.mrb[5].mxu0  ;;  %2778 = vmatprep.subr.bf16.mxu0 %v3248_v63  ;;  %2787 = vmatprep.subr.bf16.mxu1 %v3248_v63 }
 0x213   :  { %2553 = vmatprep.mubr.msk.f32.mxu0 %vm3251_vm1, %v3246_v0 }
 0x214   :  { %v3074_v31 = vpop.permute.xlu0 %3073  ;;  %2535 = vmatmul.mubr.msk.f32.vlgmr.msra.gmra.mrb[16].mxu1 %vm470_vm2, %v1707_v27 }
 0x215   :  { %v3076_v37 = vunpack.i.h.bf16 %v3074_v31  ;;  %v3075_v32 = vunpack.i.l.bf16 %v3074_v31  ;;  %2780 = vmatpush3.bf16.msra.mxu0 %v2779_v43  ;;  %2789 = vmatpush3.bf16.msra.mxu1 %v2788_v26  ;;  %v2079_v26 = vrot.slane %v2074_v15, %v120_v23 }
 0x216   :  { %2781 = vmatprep.subr.bf16.mxu0 %v3248_v63  ;;  %2790 = vmatprep.subr.bf16.mxu1 %v3248_v63 }
 0x217   :  { %v2791_v24 = vpack.c.bf16 %v3076_v37, %v3075_v32  ;;  %2572 = vmatprep.mubr.msk.f32.mxu1 %vm3251_vm1, %v3246_v0 }
 0x218   :  { %v3084_v39 = vpop.permute.xlu0 %3083 }
 0x219   :  { %v3086_v41 = vunpack.i.h.bf16 %v3084_v39  ;;  %v3085_v42 = vunpack.i.l.bf16 %v3084_v39  ;;  %2783 = vmatpush3.bf16.msra.mxu0 %v2782_v35  ;;  %2792 = vmatpush3.bf16.msra.mxu1 %v2791_v24 }
 0x21a   :  { %2784 = vmatprep.subr.bf16.mxu0 %v3248_v63  ;;  %2793 = vmatprep.subr.bf16.mxu1 %v3248_v63 }
 0x21b   :  { %v2794_v44 = vpack.c.bf16 %v3086_v41, %v3085_v42 }
 0x21c   :  { %v3094_v45 = vpop.permute.xlu0 %3093 }
 0x21d   :  { %v3096_v46 = vunpack.i.h.bf16 %v3094_v45  ;;  %v3095_v5 = vunpack.i.l.bf16 %v3094_v45  ;;  %2786 = vmatpush3.bf16.msra.mxu0 %v2785_v40  ;;  %2795 = vmatpush3.bf16.msra.mxu1 %v2794_v44 }
 0x21e   :  { %2796 = vmatprep.subr.bf16.mxu1 %v3248_v63 }
 0x21f   :  { %v2797_v6 = vpack.c.bf16 %v3096_v46, %v3095_v5  ;;  %v2083_v5 = vrot.slane %v2074_v15, %v124_v25 }
 0x220   :  { %2554 = vmatmul.mubr.msk.f32.vlgmr.msra.gmra.mrb[18].mxu0 %vm470_vm2, %v453_v38 }
 0x221   :  { %v743_v0 = vpop.f32.mrb[6].mxu0  ;;  %2798 = vmatpush3.bf16.msra.mxu1 %v2797_v6 }
 0x222   :  { %2004 = vrot.lane.b32.xlu0 %v743_v0, %s3253_s7  ;;  %v2327_v48 = vpop.f32.mrb[7].mxu0 }
 0x224   :  { %2573 = vmatmul.mubr.msk.f32.vlgmr.msra.gmra.mrb[18].mxu1 %vm470_vm2, %v1902_v49 }
 0x284   :  { %v646_v16 = vpop.f32.mrb[4].mxu1 }
 0x285   :  { %v2308_v18 = vpop.f32.mrb[5].mxu1 }
 0x294   :  { %v841_v9 = vpop.f32.mrb[6].mxu1  ;;  %v2005_v8 = vpop.permute.xlu0 %2004 }
 0x295   :  { %v2346_v10 = vpop.f32.mrb[7].mxu1 }
 0x2a3   :  { %v938_v50 = vpop.f32.mrb[8].mxu0 }
 0x2a4   :  { %v1036_v51 = vpop.f32.mrb[8].mxu1  ;;  %2012 = vrot.lane.b32.xlu0 %v938_v50, %s3239_s29  ;;  %v2365_v63 = vpop.f32.mrb[9].mxu0 }
 0x2a5   :  { %v2384_v36 = vpop.f32.mrb[9].mxu1 }
 0x2b3   :  { %v1133_v52 = vpop.f32.mrb[10].mxu0 }
 0x2b4   :  { %2020 = vrot.lane.b32.xlu0 %v1133_v52, %s3250_s6  ;;  %v2403_v38 = vpop.f32.mrb[11].mxu0 }
 0x2b7   :  { %v1231_v28 = vpop.f32.mrb[10].mxu1 }
 0x2b8   :  { %v2422_v30 = vpop.f32.mrb[11].mxu1  ;;  %2000 = vrot.lane.b32.xlu0 %v646_v16, %s3242_s17 }
 0x2bc   :  { %2008 = vrot.lane.b32.xlu0 %v841_v9, %s3252_s3 }
 0x2c0   :  { %2016 = vrot.lane.b32.xlu0 %v1036_v51, %s3249_s30 }
 0x2c3   :  { %v1304_v21 = vpop.f32.mrb[12].mxu0 }
 0x2c4   :  { %2024 = vrot.lane.b32.xlu0 %v1231_v28, %s3247_s4  ;;  %v2441_v53 = vpop.f32.mrb[13].mxu0 }
 0x2c7   :  { %v1410_v60 = vpop.f32.mrb[12].mxu1 }
 0x2c8   :  { %v2460_v17 = vpop.f32.mrb[13].mxu1 }
 0x2d3   :  { %v1507_v54 = vpop.f32.mrb[14].mxu0 }
 0x2d4   :  { %2032 = vrot.lane.b32.xlu1 %v1507_v54, %s3253_s7  ;;  %v2479_v55 = vpop.f32.mrb[15].mxu0 }
 0x2d7   :  { %v1605_v56 = vpop.f32.mrb[14].mxu1 }
 0x2d8   :  { %v2498_v57 = vpop.f32.mrb[15].mxu1 }
 0x2e3   :  { %v1702_v58 = vpop.f32.mrb[16].mxu0 }
 0x2e4   :  { %2040 = vrot.lane.b32.xlu1 %v1702_v58, %s3239_s29  ;;  %v2517_v61 = vpop.f32.mrb[17].mxu0  ;;  %s3254_s29 = smov [#allocation11]  }
 0x2e7   :  { %v1800_v12 = vpop.f32.mrb[16].mxu1 }
 0x2e8   :  { %v2536_v13 = vpop.f32.mrb[17].mxu1 }
 0x2f3   :  { %v1897_v62 = vpop.f32.mrb[18].mxu0 }
 0x2f4   :  { %2048 = vrot.lane.b32.xlu1 %v1897_v62, %s3250_s6  ;;  %v2555_v1 = vpop.f32.mrb[19].mxu0 }
 0x2f7   :  { %v1995_v2 = vpop.f32.mrb[18].mxu1 }
 0x2f8   :  { %v2574_v3 = vpop.f32.mrb[19].mxu1  ;;  %2028 = vrot.lane.b32.xlu1 %v1410_v60, %s3242_s17  ;;  %s2096_s17 = sshll.u32 %s3254_s29, 4  ;;  %s2097_s17 = int_to_ptr.vmem [resolvable:$true] %s2096_s17 }
 0x2f9   :  { %s3207_s8 = scalar_lea.vmem %s2097_s17, 256  ;;  %p3212_p13 = scmp.lt.s32.totalorder %s2097_s17, %s2097_s17 }
 0x2fa   :  { %p3208_p12 = scmp.ne.s32.totalorder %s2097_s17, %s3207_s8  ;;  %p3213_p0 = scmp.lt.s32.totalorder %s3207_s8, %s3207_s8 }
 0x2fc   :  { %2036 = vrot.lane.b32.xlu1 %v1605_v56, %s3252_s3  ;;  %p3214_p1 = por %p3213_p0, %p3212_p13 }
 0x2fe   :  { %p3215_p2 = pnand %p3214_p1, %p3208_p12 }
 0x300   :  { %2044 = vrot.lane.b32.xlu1 %v1800_v12, %s3249_s30 }
 0x304   :  { %2052 = vrot.lane.b32.xlu1 %v1995_v2, %s3247_s4 }
 0x316   :  { %v2013_v4 = vpop.permute.xlu0 %2012 }
 0x326   :  { %v2021_v7 = vpop.permute.xlu0 %2020 }
 0x32a   :  { %v2001_v11 = vpop.permute.xlu0 %2000 }
 0x32b   :  { %v2056_v47 = vsel %vm2055_vm3, %v3685_v19, %v2001_v11 }
 0x32c   :  { %v2057_v14 = vsel %vm158_vm0, %v2056_v47, %v2005_v8 }
 0x32e   :  { %v2009_v27 = vpop.permute.xlu0 %2008 }
 0x32f   :  { %v2059_v29 = vsel %vm2058_vm4, %v2057_v14, %v2009_v27 }
 0x330   :  { %v2060_v43 = vsel %vm470_vm2, %v2059_v29, %v2013_v4 }
 0x332   :  { %v2017_v59 = vpop.permute.xlu0 %2016 }
 0x333   :  { %v2062_v20 = vsel %vm2061_vm5, %v2060_v43, %v2017_v59 }
 0x334   :  { %v2064_v19 = vsel %vm2063_vm6, %v2062_v20, %v2021_v7 }
 0x336   :  { %v2025_v35 = vpop.permute.xlu0 %2024 }
 0x337   :  { %v2066_v31 = vsel %vm2065_vm7, %v2064_v19, %v2025_v35 }
 0x338   :  { %v2086_v37 = vadd.f32 %v2079_v26, %v2066_v31 }
 0x33a   :  { %2088 = vst [vmem:[#allocation11] sm:$0xff] %v2086_v37 }
 0x346   :  { %v2033_v32 = vpop.permute.xlu1 %2032 }
 0x356   :  { %v2041_v33 = vpop.permute.xlu1 %2040 }
 0x366   :  { %v2049_v34 = vpop.permute.xlu1 %2048 }
 0x36a   :  { %v2029_v24 = vpop.permute.xlu1 %2028 }
 0x36b   :  { %v2067_v39 = vsel %vm2055_vm3, %v1304_v21, %v2029_v24 }
 0x36c   :  { %v2068_v40 = vsel %vm158_vm0, %v2067_v39, %v2033_v32 }
 0x36e   :  { %v2037_v41 = vpop.permute.xlu1 %2036 }
 0x36f   :  { %v2069_v42 = vsel %vm2058_vm4, %v2068_v40, %v2037_v41 }
 0x370   :  { %v2070_v23 = vsel %vm470_vm2, %v2069_v42, %v2041_v33 }
 0x372   :  { %v2045_v44 = vpop.permute.xlu1 %2044 }
 0x373   :  { %v2071_v45 = vsel %vm2061_vm5, %v2070_v23, %v2045_v44 }
 0x374   :  { %v2072_v46 = vsel %vm2063_vm6, %v2071_v45, %v2049_v34 }
 0x376   :  { %v2053_v6 = vpop.permute.xlu1 %2052 }
 0x377   :  { %v2073_v0 = vsel %vm2065_vm7, %v2072_v46, %v2053_v6 }
 0x378   :  { %v2087_v48 = vadd.f32 %v2083_v5, %v2073_v0 }
 0x37a   :  { %2089 = vst [vmem:[#allocation11 + $0x8] sm:$0xff] %v2087_v48 }
 0x37b   :  { %3218 = shalt.err (!%p3215_p2)
}
 0x37c   :  { %s3219_s11 = scalar_lea.hbm %s3753_s5, 256 }
 0x37d   :  { %p3220_p3 = scmp.ne.s32.totalorder %s3753_s5, %s3219_s11  ;;  %p3223_p4 = scmp.lt.u32.totalorder %s3219_s11, %s3753_s5 }
 0x37f   :  { %p3225_p5 = pnand %p3223_p4, %p3220_p3 }
 0x381   :  { %3228 = shalt.err (!%p3225_p5)
}
 0x382   :  { %2099 = dma.vmem_to_hbm [thread:$0]  %s2097_s17, 256, %s3753_s5, [#allocation4]  }
 0x383   :  { %3235 = dma.done.wait [#allocation4], 256  }
 0x384   :  { %3236 = vsyncadd [#allocation4], 4294967040 }
 0x385   :  { %2103 = vsyncpa [#allocation3], 1 }
 0x386   :  { %2104 = vsyncpa [#allocation6], 1 }
 0x387   :  { %2105 = vsyncpa [#allocation9], 1 }
 0x388   :  { %2106 = vsyncpa [#allocation4], 1 }

</bundles_post_ra>
